<compile_context>
chip_gen: v5e
topology: v5e:2x2
jax: 0.10.0
libtpu: 0.0.40
codegen_flags: <defaults>
</compile_context>

<pallas_src>
import functools
import math

import jax
import jax.numpy as jnp
from jax.experimental import pallas as pl
from jax.experimental.pallas import tpu as pltpu


def _layernorm(x, gamma, beta, eps=1e-5):
    # PyTorch nn.LayerNorm: biased variance over last dim, eps inside sqrt.
    mu = jnp.mean(x, axis=-1, keepdims=True)
    var = jnp.mean((x - mu) ** 2, axis=-1, keepdims=True)
    return (x - mu) * jax.lax.rsqrt(var + eps) * gamma + beta


def encoder_stack_kernel(x_ref, mask_ref,
                         wqkv_ref, bqkv_ref,
                         wo_ref, bo_ref, g1_ref, be1_ref,
                         w1_ref, b1_ref, w2_ref, b2_ref, g2_ref, be2_ref,
                         out_ref, act_ref, *, heads):
    layer = pl.program_id(1)
    TB, S, E = x_ref.shape
    rows = TB * S
    Dh = E // heads
    scale = 1.0 / math.sqrt(Dh)
    cdt = wqkv_ref.dtype                     # MXU input dtype (bf16 by default)

    # First layer: load the input tile into the resident VMEM activation carry.
    @pl.when(layer == 0)
    def _():
        act_ref[...] = x_ref[...].reshape(rows, E)

    x2d = act_ref[...]                       # (rows, E) float32
    xb = x2d.astype(cdt)

    # --- fused QKV projection over the whole batch tile (rows = TB*S) ---
    qkv = jnp.dot(xb, wqkv_ref[0],
                  preferred_element_type=jnp.float32) + bqkv_ref[0]   # (rows, 3E)
    q = qkv[:, :E] * scale                   # fold 1/sqrt(Dh) into q (once)
    k = qkv[:, E:2 * E]
    v = qkv[:, 2 * E:]

    # additive mask bias, computed once (hoisted out of the head loop)
    neg = jnp.where(mask_ref[...] == 0.0,
                    jnp.float32(-1e9), jnp.float32(0.0))              # (TB, 1, S)

    wo_all = wo_ref[0]                       # (heads, Dh, E), pre-split per head

    attn = jnp.zeros((rows, E), jnp.float32)
    for h in range(heads):                   # static unroll; matmuls batched over TB
        sl = slice(h * Dh, (h + 1) * Dh)
        qh = q[:, sl].reshape(TB, S, Dh).astype(cdt)
        kh = k[:, sl].reshape(TB, S, Dh).astype(cdt)
        vh = v[:, sl].reshape(TB, S, Dh).astype(cdt)
        # scores: contraction over Dh handles the k-transpose (no XLU transpose)
        s = jnp.einsum('bqd,bkd->bqk', qh, kh,
                       preferred_element_type=jnp.float32) + neg
        s = s - jnp.max(s, axis=-1, keepdims=True)
        p = jnp.exp(s)
        p = p * pl.reciprocal(jnp.sum(p, axis=-1, keepdims=True), approx=True)
        ctx = jnp.einsum('bqk,bkd->bqd', p.astype(cdt), vh,
                         preferred_element_type=jnp.float32)          # (TB, S, Dh)
        # fold the output projection into the head loop (no concat / transpose):
        attn = attn + jnp.dot(ctx.reshape(rows, Dh).astype(cdt), wo_all[h],
                              preferred_element_type=jnp.float32)
    attn = attn + bo_ref[0]

    # --- residual + LayerNorm 1 (dropout = identity) ---
    h1 = _layernorm(attn + x2d, g1_ref[0], be1_ref[0])

    # --- FeedForward: fc2(relu(fc1(x))) ---
    ff = jnp.dot(h1.astype(cdt), w1_ref[0],
                 preferred_element_type=jnp.float32) + b1_ref[0]
    ff = jnp.maximum(ff, 0.0)
    ff = jnp.dot(ff.astype(cdt), w2_ref[0],
                 preferred_element_type=jnp.float32) + b2_ref[0]

    # --- residual + LayerNorm 2 (dropout = identity) ---
    h2 = _layernorm(ff + h1, g2_ref[0], be2_ref[0])

    act_ref[...] = h2                        # carry to next layer (stays in VMEM)

    @pl.when(layer == pl.num_programs(1) - 1)
    def _():
        out_ref[...] = h2.reshape(TB, S, E)


def _pick_batch_tile(B, S, max_rows=1024):
    """Largest divisor of B such that TB*S rows still fits a comfortable VMEM tile."""
    tb = 1
    for cand in range(1, B + 1):
        if B % cand == 0 and cand * S <= max_rows:
            tb = cand
    return tb


def encoder_stack(x, mask, sp, heads):
    """All transformer layers in one pallas_call; activations stay in VMEM."""
    B, S, E = x.shape
    L = sp["wqkv"].shape[0]
    F = sp["w1"].shape[2]
    Dh = E // heads
    TB = _pick_batch_tile(B, S)
    nb = B // TB

    def bspec(*trail):      # batch-tiled operand (constant across the layer axis)
        n = len(trail)
        return pl.BlockSpec((TB,) + trail, lambda b, l, _n=n: (b,) + (0,) * _n)

    def wspec(*trail):      # per-layer stacked weight, streamed along the layer axis
        n = len(trail)
        return pl.BlockSpec((1,) + trail, lambda b, l, _n=n: (l,) + (0,) * _n)

    in_specs = [
        bspec(S, E),                        # x
        bspec(1, S),                        # mask
        wspec(E, 3 * E), wspec(1, 3 * E),   # wqkv, bqkv   (fused Q/K/V projection)
        wspec(heads, Dh, E), wspec(1, E),   # wo (pre-split per head), bo
        wspec(1, E), wspec(1, E),           # gamma1, beta1
        wspec(E, F), wspec(1, F),           # w1, b1
        wspec(F, E), wspec(1, E),           # w2, b2
        wspec(1, E), wspec(1, E),           # gamma2, beta2
    ]

    kernel = functools.partial(encoder_stack_kernel, heads=heads)
    return pl.pallas_call(
        kernel,
        out_shape=jax.ShapeDtypeStruct((B, S, E), jnp.float32),
        grid=(nb, L),
        in_specs=in_specs,
        out_specs=pl.BlockSpec((TB, S, E), lambda b, l: (b, 0, 0)),
        scratch_shapes=[pltpu.VMEM((TB * S, E), jnp.float32)],
        compiler_params=pltpu.CompilerParams(
            dimension_semantics=("parallel", "arbitrary"),
            vmem_limit_bytes=32 * 1024 * 1024),
    )(x, mask,
      sp["wqkv"], sp["bqkv"], sp["wo"], sp["bo"], sp["g1"], sp["be1"],
      sp["w1"], sp["b1"], sp["w2"], sp["b2"], sp["g2"], sp["be2"])


def init_encoder_params(key, vocab, E, num_layers, expansion, max_len):
    keys = jax.random.split(key, 1 + num_layers)
    params = {}
    # nn.Embedding default init: N(0, 1)
    params["embedding"] = jax.random.normal(keys[0], (vocab, E), jnp.float32)

    # Positional-encoding table (max_len, E), matching the PyTorch buffer.
    pos = jnp.arange(max_len, dtype=jnp.float32)[:, None]
    div = jnp.exp(jnp.arange(0, E, 2, dtype=jnp.float32) * (-math.log(10000.0) / E))
    pe = jnp.zeros((max_len, E), jnp.float32)
    pe = pe.at[:, 0::2].set(jnp.sin(pos * div))
    pe = pe.at[:, 1::2].set(jnp.cos(pos * div))
    params["pe"] = pe

    F = expansion * E

    def lin(k, fan_in, fan_out):
        # nn.Linear default init: U(-1/sqrt(fan_in), ...); W stored (in, out)
        bound = 1.0 / math.sqrt(fan_in)
        kw, kb = jax.random.split(k)
        w = jax.random.uniform(kw, (fan_in, fan_out), jnp.float32, -bound, bound)
        b = jax.random.uniform(kb, (1, fan_out), jnp.float32, -bound, bound)
        return w, b

    layers = []
    for li in range(num_layers):
        lk = jax.random.split(keys[1 + li], 6)
        wq, bq = lin(lk[0], E, E)
        wk, bk = lin(lk[1], E, E)
        wv, bv = lin(lk[2], E, E)
        wo, bo = lin(lk[3], E, E)
        w1, b1 = lin(lk[4], E, F)
        w2, b2 = lin(lk[5], F, E)
        layers.append(dict(
            wq=wq, bq=bq, wk=wk, bk=bk, wv=wv, bv=bv, wo=wo, bo=bo,
            g1=jnp.ones((1, E), jnp.float32), be1=jnp.zeros((1, E), jnp.float32),
            w1=w1, b1=b1, w2=w2, b2=b2,
            g2=jnp.ones((1, E), jnp.float32), be2=jnp.zeros((1, E), jnp.float32),
        ))
    params["layers"] = layers
    return params


def stack_layer_params(layers, heads, mxu_dtype=jnp.bfloat16):
    """Stack per-layer params to (L, ...), fuse QKV, cast matmul weights to MXU dtype."""
    L = len(layers)
    E = layers[0]["wq"].shape[0]
    Dh = E // heads

    def st(name):
        return jnp.stack([lp[name] for lp in layers])

    sp = {}
    # fused QKV projection: (L, E, 3E) weight, (L, 1, 3E) bias
    sp["wqkv"] = jnp.concatenate([st("wq"), st("wk"), st("wv")],
                                 axis=-1).astype(mxu_dtype)
    sp["bqkv"] = jnp.concatenate([st("bq"), st("bk"), st("bv")], axis=-1)
    # pre-split the output projection per head: rows [h*Dh:(h+1)*Dh] -> index h
    sp["wo"] = st("wo").reshape(L, heads, Dh, E).astype(mxu_dtype)
    sp["w1"] = st("w1").astype(mxu_dtype)
    sp["w2"] = st("w2").astype(mxu_dtype)
    for nm in ("bo", "b1", "b2", "g1", "be1", "g2", "be2"):
        sp[nm] = st(nm)                      # keep f32 (added after f32 accumulation)
    return sp


def encoder_forward(params, token_ids, mask, heads, mxu_dtype=jnp.bfloat16):
    B, S = token_ids.shape
    # glue: embedding gather (kept in plain JAX)
    emb = jnp.take(params["embedding"], token_ids, axis=0)           # (B, S, E)
    # PyTorch quirk reproduced: pos_encoding buffer is (max_len, 1, E) and is
    # indexed by x.size(0) (= BATCH), broadcasting over the sequence dimension.
    out = emb + params["pe"][:B][:, None, :]
    # dropout: identity (inference)
    sp = stack_layer_params(params["layers"], heads, mxu_dtype)
    return encoder_stack(out, mask, sp, heads)


if __name__ == "__main__":
    B, S, E, HEADS, LAYERS = 2, 8, 32, 4, 2
    VOCAB, EXPANSION, MAX_LEN = 50, 4, 16

    key = jax.random.PRNGKey(0)
    kp, kx = jax.random.split(key)
    params = init_encoder_params(kp, VOCAB, E, LAYERS, EXPANSION, MAX_LEN)

    token_ids = jax.random.randint(kx, (B, S), 0, VOCAB)
    # padding-style mask: 1 = attend, 0 = masked (last two key positions masked)
    mask = jnp.ones((B, 1, S), jnp.float32).at[:, :, S - 2:].set(0.0)

    out = encoder_forward(params, token_ids, mask, HEADS)
    jax.block_until_ready(out)
    assert out.shape == (B, S, E)
    assert bool(jnp.isfinite(out).all())
    print("KERNEL_OK")
</pallas_src>

<mosaic_0001>
module attributes {stable_mosaic.version = 11 : i64} {
  func.func @encoder_stack_kernel(%arg0: i32, %arg1: i32, %arg2: memref<2x8x32xf32, #tpu.memory_space<vmem>>, %arg3: memref<2x1x8xf32, #tpu.memory_space<vmem>>, %arg4: memref<1x32x96xbf16, #tpu.memory_space<vmem>>, %arg5: memref<1x1x96xf32, #tpu.memory_space<vmem>>, %arg6: memref<1x4x8x32xbf16, #tpu.memory_space<vmem>>, %arg7: memref<1x1x32xf32, #tpu.memory_space<vmem>>, %arg8: memref<1x1x32xf32, #tpu.memory_space<vmem>>, %arg9: memref<1x1x32xf32, #tpu.memory_space<vmem>>, %arg10: memref<1x32x128xbf16, #tpu.memory_space<vmem>>, %arg11: memref<1x1x128xf32, #tpu.memory_space<vmem>>, %arg12: memref<1x128x32xbf16, #tpu.memory_space<vmem>>, %arg13: memref<1x1x32xf32, #tpu.memory_space<vmem>>, %arg14: memref<1x1x32xf32, #tpu.memory_space<vmem>>, %arg15: memref<1x1x32xf32, #tpu.memory_space<vmem>>, %arg16: memref<2x8x32xf32, #tpu.memory_space<vmem>>, %arg17: memref<16x32xf32, #tpu.memory_space<vmem>>) attributes {dimension_semantics = [#tpu.dimension_semantics<parallel>, #tpu.dimension_semantics<arbitrary>], iteration_bounds = array<i64: 1, 2>, scalar_prefetch = 0 : i64, scratch_operands = 1 : i64, tpu.core_type = #tpu.core_type<tc>, window_params = [{transform_indices = @transform_0, window_bounds = array<i64: 2, 8, 32>}, {transform_indices = @transform_1, window_bounds = array<i64: 2, 1, 8>}, {transform_indices = @transform_2, window_bounds = array<i64: 1, 32, 96>}, {transform_indices = @transform_3, window_bounds = array<i64: 1, 1, 96>}, {transform_indices = @transform_4, window_bounds = array<i64: 1, 4, 8, 32>}, {transform_indices = @transform_5, window_bounds = array<i64: 1, 1, 32>}, {transform_indices = @transform_6, window_bounds = array<i64: 1, 1, 32>}, {transform_indices = @transform_7, window_bounds = array<i64: 1, 1, 32>}, {transform_indices = @transform_8, window_bounds = array<i64: 1, 32, 128>}, {transform_indices = @transform_9, window_bounds = array<i64: 1, 1, 128>}, {transform_indices = @transform_10, window_bounds = array<i64: 1, 128, 32>}, {transform_indices = @transform_11, window_bounds = array<i64: 1, 1, 32>}, {transform_indices = @transform_12, window_bounds = array<i64: 1, 1, 32>}, {transform_indices = @transform_13, window_bounds = array<i64: 1, 1, 32>}, {transform_indices = @transform_14, window_bounds = array<i64: 2, 8, 32>}]} {
    %c0_i32 = arith.constant 0 : i32
    %0 = arith.cmpi eq, %arg1, %c0_i32 : i32
    %1 = arith.extui %0 : i1 to i32
    %c0_i32_0 = arith.constant 0 : i32
    %2 = arith.cmpi ne, %1, %c0_i32_0 : i32
    scf.if %2 {
      %c0_83 = arith.constant 0 : index
      %c0_84 = arith.constant 0 : index
      %c0_85 = arith.constant 0 : index
      %226 = vector.load %arg2[%c0_83, %c0_84, %c0_85] : memref<2x8x32xf32, #tpu.memory_space<vmem>>, vector<2x8x32xf32>
      %227 = vector.shape_cast %226 : vector<2x8x32xf32> to vector<16x32xf32>
      %c0_86 = arith.constant 0 : index
      %c0_87 = arith.constant 0 : index
      %228 = vector.load %arg17[%c0_86, %c0_87] : memref<16x32xf32, #tpu.memory_space<vmem>>, vector<16x32xf32>
      tpu.vector_store %arg17[%c0_86, %c0_87], %227 {strides = array<i32>} : memref<16x32xf32, #tpu.memory_space<vmem>>, vector<16x32xf32>,
    } else {
    }
    %c0 = arith.constant 0 : index
    %c0_1 = arith.constant 0 : index
    %3 = vector.load %arg17[%c0, %c0_1] : memref<16x32xf32, #tpu.memory_space<vmem>>, vector<16x32xf32>
    %4 = arith.truncf %3 : vector<16x32xf32> to vector<16x32xbf16>
    %c0_2 = arith.constant 0 : index
    %c0_3 = arith.constant 0 : index
    %c0_4 = arith.constant 0 : index
    %5 = vector.load %arg4[%c0_2, %c0_3, %c0_4] : memref<1x32x96xbf16, #tpu.memory_space<vmem>>, vector<1x32x96xbf16>
    %6 = vector.shape_cast %5 : vector<1x32x96xbf16> to vector<32x96xbf16>
    %cst = arith.constant dense<0.000000e+00> : vector<16x96xf32>
    %7 = tpu.matmul %4, %6, %cst {dimension_numbers = #tpu.dot_dimension_numbers<[1], [0], [0], [1], [0, 0, 1, 1], [], []>} : vector<16x32xbf16>, vector<32x96xbf16>, vector<16x96xf32> -> vector<16x96xf32>
    %c0_5 = arith.constant 0 : index
    %c0_6 = arith.constant 0 : index
    %c0_7 = arith.constant 0 : index
    %8 = vector.load %arg5[%c0_5, %c0_6, %c0_7] : memref<1x1x96xf32, #tpu.memory_space<vmem>>, vector<1x1x96xf32>
    %9 = vector.shape_cast %8 : vector<1x1x96xf32> to vector<1x96xf32>
    %10 = vector.broadcast %9 : vector<1x96xf32> to vector<16x96xf32>
    %11 = arith.addf %7, %10 : vector<16x96xf32>
    %12 = vector.extract_strided_slice %11 {offsets = [0, 0], sizes = [16, 32], strides = [1, 1]} : vector<16x96xf32> to vector<16x32xf32>
    %cst_8 = arith.constant 0.353553385 : f32
    %13 = vector.broadcast %cst_8 : f32 to vector<16x32xf32>
    %14 = arith.mulf %12, %13 : vector<16x32xf32>
    %15 = vector.extract_strided_slice %11 {offsets = [0, 32], sizes = [16, 32], strides = [1, 1]} : vector<16x96xf32> to vector<16x32xf32>
    %16 = vector.extract_strided_slice %11 {offsets = [0, 64], sizes = [16, 32], strides = [1, 1]} : vector<16x96xf32> to vector<16x32xf32>
    %c0_9 = arith.constant 0 : index
    %c0_10 = arith.constant 0 : index
    %c0_11 = arith.constant 0 : index
    %17 = vector.load %arg3[%c0_9, %c0_10, %c0_11] : memref<2x1x8xf32, #tpu.memory_space<vmem>>, vector<2x1x8xf32>
    %cst_12 = arith.constant 0.000000e+00 : f32
    %18 = vector.broadcast %cst_12 : f32 to vector<2x1x8xf32>
    %19 = arith.cmpf oeq, %17, %18 : vector<2x1x8xf32>
    %cst_13 = arith.constant -1.000000e+09 : f32
    %cst_14 = arith.constant 0.000000e+00 : f32
    %20 = vector.broadcast %cst_13 : f32 to vector<2x1x8xf32>
    %21 = vector.broadcast %cst_14 : f32 to vector<2x1x8xf32>
    %22 = arith.select %19, %20, %21 : vector<2x1x8xi1>, vector<2x1x8xf32>
    %c0_15 = arith.constant 0 : index
    %c0_16 = arith.constant 0 : index
    %c0_17 = arith.constant 0 : index
    %c0_18 = arith.constant 0 : index
    %23 = vector.load %arg6[%c0_15, %c0_16, %c0_17, %c0_18] : memref<1x4x8x32xbf16, #tpu.memory_space<vmem>>, vector<1x4x8x32xbf16>
    %24 = vector.shape_cast %23 : vector<1x4x8x32xbf16> to vector<4x8x32xbf16>
    %cst_19 = arith.constant 0.000000e+00 : f32
    %25 = vector.broadcast %cst_19 : f32 to vector<16x32xf32>
    %26 = vector.extract_strided_slice %14 {offsets = [0, 0], sizes = [16, 8], strides = [1, 1]} : vector<16x32xf32> to vector<16x8xf32>
    %27 = vector.shape_cast %26 : vector<16x8xf32> to vector<2x8x8xf32>
    %28 = arith.truncf %27 : vector<2x8x8xf32> to vector<2x8x8xbf16>
    %29 = vector.extract_strided_slice %15 {offsets = [0, 0], sizes = [16, 8], strides = [1, 1]} : vector<16x32xf32> to vector<16x8xf32>
    %30 = vector.shape_cast %29 : vector<16x8xf32> to vector<2x8x8xf32>
    %31 = arith.truncf %30 : vector<2x8x8xf32> to vector<2x8x8xbf16>
    %32 = vector.extract_strided_slice %16 {offsets = [0, 0], sizes = [16, 8], strides = [1, 1]} : vector<16x32xf32> to vector<16x8xf32>
    %33 = vector.shape_cast %32 : vector<16x8xf32> to vector<2x8x8xf32>
    %34 = arith.truncf %33 : vector<2x8x8xf32> to vector<2x8x8xbf16>
    "tpu.trace_start"() <{level = 10 : i32, message = "bqd,bkd->bqk"}> : () -> ()
    %cst_20 = arith.constant dense<0.000000e+00> : vector<2x8x8xf32>
    %35 = tpu.matmul %28, %31, %cst_20 {dimension_numbers = #tpu.dot_dimension_numbers<[2], [2], [1], [1], [0, 0, 0, 1, 1, 1], [0], [0]>} : vector<2x8x8xbf16>, vector<2x8x8xbf16>, vector<2x8x8xf32> -> vector<2x8x8xf32>
    "tpu.trace_stop"() : () -> ()
    %36 = vector.broadcast %22 : vector<2x1x8xf32> to vector<2x8x8xf32>
    %37 = arith.addf %35, %36 : vector<2x8x8xf32>
    %cst_21 = arith.constant dense<0xFF800000> : vector<2x8xf32>
    %38 = vector.multi_reduction <maximumf>, %37, %cst_21 [2] : vector<2x8x8xf32> to vector<2x8xf32>
    %39 = vector.shape_cast %38 : vector<2x8xf32> to vector<2x8x1xf32>
    %40 = vector.broadcast %39 : vector<2x8x1xf32> to vector<2x8x8xf32>
    %41 = arith.subf %37, %40 : vector<2x8x8xf32>
    %42 = math.exp %41 : vector<2x8x8xf32>
    %cst_22 = arith.constant dense<0.000000e+00> : vector<2x8xf32>
    %43 = vector.multi_reduction <add>, %42, %cst_22 [2] : vector<2x8x8xf32> to vector<2x8xf32>
    %44 = vector.shape_cast %43 : vector<2x8xf32> to vector<2x8x1xf32>
    %45 = tpu.reciprocal %44 {approx = true} : vector<2x8x1xf32> -> vector<2x8x1xf32>
    %46 = vector.broadcast %45 : vector<2x8x1xf32> to vector<2x8x8xf32>
    %47 = arith.mulf %42, %46 : vector<2x8x8xf32>
    %48 = arith.truncf %47 : vector<2x8x8xf32> to vector<2x8x8xbf16>
    "tpu.trace_start"() <{level = 10 : i32, message = "bqk,bkd->bqd"}> : () -> ()
    %cst_23 = arith.constant dense<0.000000e+00> : vector<2x8x8xf32>
    %49 = tpu.matmul %48, %34, %cst_23 {dimension_numbers = #tpu.dot_dimension_numbers<[2], [1], [1], [2], [0, 0, 0, 1, 1, 2], [0], [0]>} : vector<2x8x8xbf16>, vector<2x8x8xbf16>, vector<2x8x8xf32> -> vector<2x8x8xf32>
    "tpu.trace_stop"() : () -> ()
    %50 = vector.shape_cast %49 : vector<2x8x8xf32> to vector<16x8xf32>
    %51 = arith.truncf %50 : vector<16x8xf32> to vector<16x8xbf16>
    %52 = vector.extract_strided_slice %24 {offsets = [0, 0, 0], sizes = [1, 8, 32], strides = [1, 1, 1]} : vector<4x8x32xbf16> to vector<1x8x32xbf16>
    %53 = vector.shape_cast %52 : vector<1x8x32xbf16> to vector<8x32xbf16>
    %cst_24 = arith.constant dense<0.000000e+00> : vector<16x32xf32>
    %54 = tpu.matmul %51, %53, %cst_24 {dimension_numbers = #tpu.dot_dimension_numbers<[1], [0], [0], [1], [0, 0, 1, 1], [], []>} : vector<16x8xbf16>, vector<8x32xbf16>, vector<16x32xf32> -> vector<16x32xf32>
    %55 = arith.addf %25, %54 : vector<16x32xf32>
    %56 = vector.extract_strided_slice %14 {offsets = [0, 8], sizes = [16, 8], strides = [1, 1]} : vector<16x32xf32> to vector<16x8xf32>
    %57 = vector.shape_cast %56 : vector<16x8xf32> to vector<2x8x8xf32>
    %58 = arith.truncf %57 : vector<2x8x8xf32> to vector<2x8x8xbf16>
    %59 = vector.extract_strided_slice %15 {offsets = [0, 8], sizes = [16, 8], strides = [1, 1]} : vector<16x32xf32> to vector<16x8xf32>
    %60 = vector.shape_cast %59 : vector<16x8xf32> to vector<2x8x8xf32>
    %61 = arith.truncf %60 : vector<2x8x8xf32> to vector<2x8x8xbf16>
    %62 = vector.extract_strided_slice %16 {offsets = [0, 8], sizes = [16, 8], strides = [1, 1]} : vector<16x32xf32> to vector<16x8xf32>
    %63 = vector.shape_cast %62 : vector<16x8xf32> to vector<2x8x8xf32>
    %64 = arith.truncf %63 : vector<2x8x8xf32> to vector<2x8x8xbf16>
    "tpu.trace_start"() <{level = 10 : i32, message = "bqd,bkd->bqk"}> : () -> ()
    %cst_25 = arith.constant dense<0.000000e+00> : vector<2x8x8xf32>
    %65 = tpu.matmul %58, %61, %cst_25 {dimension_numbers = #tpu.dot_dimension_numbers<[2], [2], [1], [1], [0, 0, 0, 1, 1, 1], [0], [0]>} : vector<2x8x8xbf16>, vector<2x8x8xbf16>, vector<2x8x8xf32> -> vector<2x8x8xf32>
    "tpu.trace_stop"() : () -> ()
    %66 = vector.broadcast %22 : vector<2x1x8xf32> to vector<2x8x8xf32>
    %67 = arith.addf %65, %66 : vector<2x8x8xf32>
    %cst_26 = arith.constant dense<0xFF800000> : vector<2x8xf32>
    %68 = vector.multi_reduction <maximumf>, %67, %cst_26 [2] : vector<2x8x8xf32> to vector<2x8xf32>
    %69 = vector.shape_cast %68 : vector<2x8xf32> to vector<2x8x1xf32>
    %70 = vector.broadcast %69 : vector<2x8x1xf32> to vector<2x8x8xf32>
    %71 = arith.subf %67, %70 : vector<2x8x8xf32>
    %72 = math.exp %71 : vector<2x8x8xf32>
    %cst_27 = arith.constant dense<0.000000e+00> : vector<2x8xf32>
    %73 = vector.multi_reduction <add>, %72, %cst_27 [2] : vector<2x8x8xf32> to vector<2x8xf32>
    %74 = vector.shape_cast %73 : vector<2x8xf32> to vector<2x8x1xf32>
    %75 = tpu.reciprocal %74 {approx = true} : vector<2x8x1xf32> -> vector<2x8x1xf32>
    %76 = vector.broadcast %75 : vector<2x8x1xf32> to vector<2x8x8xf32>
    %77 = arith.mulf %72, %76 : vector<2x8x8xf32>
    %78 = arith.truncf %77 : vector<2x8x8xf32> to vector<2x8x8xbf16>
    "tpu.trace_start"() <{level = 10 : i32, message = "bqk,bkd->bqd"}> : () -> ()
    %cst_28 = arith.constant dense<0.000000e+00> : vector<2x8x8xf32>
    %79 = tpu.matmul %78, %64, %cst_28 {dimension_numbers = #tpu.dot_dimension_numbers<[2], [1], [1], [2], [0, 0, 0, 1, 1, 2], [0], [0]>} : vector<2x8x8xbf16>, vector<2x8x8xbf16>, vector<2x8x8xf32> -> vector<2x8x8xf32>
    "tpu.trace_stop"() : () -> ()
    %80 = vector.shape_cast %79 : vector<2x8x8xf32> to vector<16x8xf32>
    %81 = arith.truncf %80 : vector<16x8xf32> to vector<16x8xbf16>
    %82 = vector.extract_strided_slice %24 {offsets = [1, 0, 0], sizes = [1, 8, 32], strides = [1, 1, 1]} : vector<4x8x32xbf16> to vector<1x8x32xbf16>
    %83 = vector.shape_cast %82 : vector<1x8x32xbf16> to vector<8x32xbf16>
    %cst_29 = arith.constant dense<0.000000e+00> : vector<16x32xf32>
    %84 = tpu.matmul %81, %83, %cst_29 {dimension_numbers = #tpu.dot_dimension_numbers<[1], [0], [0], [1], [0, 0, 1, 1], [], []>} : vector<16x8xbf16>, vector<8x32xbf16>, vector<16x32xf32> -> vector<16x32xf32>
    %85 = arith.addf %55, %84 : vector<16x32xf32>
    %86 = vector.extract_strided_slice %14 {offsets = [0, 16], sizes = [16, 8], strides = [1, 1]} : vector<16x32xf32> to vector<16x8xf32>
    %87 = vector.shape_cast %86 : vector<16x8xf32> to vector<2x8x8xf32>
    %88 = arith.truncf %87 : vector<2x8x8xf32> to vector<2x8x8xbf16>
    %89 = vector.extract_strided_slice %15 {offsets = [0, 16], sizes = [16, 8], strides = [1, 1]} : vector<16x32xf32> to vector<16x8xf32>
    %90 = vector.shape_cast %89 : vector<16x8xf32> to vector<2x8x8xf32>
    %91 = arith.truncf %90 : vector<2x8x8xf32> to vector<2x8x8xbf16>
    %92 = vector.extract_strided_slice %16 {offsets = [0, 16], sizes = [16, 8], strides = [1, 1]} : vector<16x32xf32> to vector<16x8xf32>
    %93 = vector.shape_cast %92 : vector<16x8xf32> to vector<2x8x8xf32>
    %94 = arith.truncf %93 : vector<2x8x8xf32> to vector<2x8x8xbf16>
    "tpu.trace_start"() <{level = 10 : i32, message = "bqd,bkd->bqk"}> : () -> ()
    %cst_30 = arith.constant dense<0.000000e+00> : vector<2x8x8xf32>
    %95 = tpu.matmul %88, %91, %cst_30 {dimension_numbers = #tpu.dot_dimension_numbers<[2], [2], [1], [1], [0, 0, 0, 1, 1, 1], [0], [0]>} : vector<2x8x8xbf16>, vector<2x8x8xbf16>, vector<2x8x8xf32> -> vector<2x8x8xf32>
    "tpu.trace_stop"() : () -> ()
    %96 = vector.broadcast %22 : vector<2x1x8xf32> to vector<2x8x8xf32>
    %97 = arith.addf %95, %96 : vector<2x8x8xf32>
    %cst_31 = arith.constant dense<0xFF800000> : vector<2x8xf32>
    %98 = vector.multi_reduction <maximumf>, %97, %cst_31 [2] : vector<2x8x8xf32> to vector<2x8xf32>
    %99 = vector.shape_cast %98 : vector<2x8xf32> to vector<2x8x1xf32>
    %100 = vector.broadcast %99 : vector<2x8x1xf32> to vector<2x8x8xf32>
    %101 = arith.subf %97, %100 : vector<2x8x8xf32>
    %102 = math.exp %101 : vector<2x8x8xf32>
    %cst_32 = arith.constant dense<0.000000e+00> : vector<2x8xf32>
    %103 = vector.multi_reduction <add>, %102, %cst_32 [2] : vector<2x8x8xf32> to vector<2x8xf32>
    %104 = vector.shape_cast %103 : vector<2x8xf32> to vector<2x8x1xf32>
    %105 = tpu.reciprocal %104 {approx = true} : vector<2x8x1xf32> -> vector<2x8x1xf32>
    %106 = vector.broadcast %105 : vector<2x8x1xf32> to vector<2x8x8xf32>
    %107 = arith.mulf %102, %106 : vector<2x8x8xf32>
    %108 = arith.truncf %107 : vector<2x8x8xf32> to vector<2x8x8xbf16>
    "tpu.trace_start"() <{level = 10 : i32, message = "bqk,bkd->bqd"}> : () -> ()
    %cst_33 = arith.constant dense<0.000000e+00> : vector<2x8x8xf32>
    %109 = tpu.matmul %108, %94, %cst_33 {dimension_numbers = #tpu.dot_dimension_numbers<[2], [1], [1], [2], [0, 0, 0, 1, 1, 2], [0], [0]>} : vector<2x8x8xbf16>, vector<2x8x8xbf16>, vector<2x8x8xf32> -> vector<2x8x8xf32>
    "tpu.trace_stop"() : () -> ()
    %110 = vector.shape_cast %109 : vector<2x8x8xf32> to vector<16x8xf32>
    %111 = arith.truncf %110 : vector<16x8xf32> to vector<16x8xbf16>
    %112 = vector.extract_strided_slice %24 {offsets = [2, 0, 0], sizes = [1, 8, 32], strides = [1, 1, 1]} : vector<4x8x32xbf16> to vector<1x8x32xbf16>
    %113 = vector.shape_cast %112 : vector<1x8x32xbf16> to vector<8x32xbf16>
    %cst_34 = arith.constant dense<0.000000e+00> : vector<16x32xf32>
    %114 = tpu.matmul %111, %113, %cst_34 {dimension_numbers = #tpu.dot_dimension_numbers<[1], [0], [0], [1], [0, 0, 1, 1], [], []>} : vector<16x8xbf16>, vector<8x32xbf16>, vector<16x32xf32> -> vector<16x32xf32>
    %115 = arith.addf %85, %114 : vector<16x32xf32>
    %116 = vector.extract_strided_slice %14 {offsets = [0, 24], sizes = [16, 8], strides = [1, 1]} : vector<16x32xf32> to vector<16x8xf32>
    %117 = vector.shape_cast %116 : vector<16x8xf32> to vector<2x8x8xf32>
    %118 = arith.truncf %117 : vector<2x8x8xf32> to vector<2x8x8xbf16>
    %119 = vector.extract_strided_slice %15 {offsets = [0, 24], sizes = [16, 8], strides = [1, 1]} : vector<16x32xf32> to vector<16x8xf32>
    %120 = vector.shape_cast %119 : vector<16x8xf32> to vector<2x8x8xf32>
    %121 = arith.truncf %120 : vector<2x8x8xf32> to vector<2x8x8xbf16>
    %122 = vector.extract_strided_slice %16 {offsets = [0, 24], sizes = [16, 8], strides = [1, 1]} : vector<16x32xf32> to vector<16x8xf32>
    %123 = vector.shape_cast %122 : vector<16x8xf32> to vector<2x8x8xf32>
    %124 = arith.truncf %123 : vector<2x8x8xf32> to vector<2x8x8xbf16>
    "tpu.trace_start"() <{level = 10 : i32, message = "bqd,bkd->bqk"}> : () -> ()
    %cst_35 = arith.constant dense<0.000000e+00> : vector<2x8x8xf32>
    %125 = tpu.matmul %118, %121, %cst_35 {dimension_numbers = #tpu.dot_dimension_numbers<[2], [2], [1], [1], [0, 0, 0, 1, 1, 1], [0], [0]>} : vector<2x8x8xbf16>, vector<2x8x8xbf16>, vector<2x8x8xf32> -> vector<2x8x8xf32>
    "tpu.trace_stop"() : () -> ()
    %126 = vector.broadcast %22 : vector<2x1x8xf32> to vector<2x8x8xf32>
    %127 = arith.addf %125, %126 : vector<2x8x8xf32>
    %cst_36 = arith.constant dense<0xFF800000> : vector<2x8xf32>
    %128 = vector.multi_reduction <maximumf>, %127, %cst_36 [2] : vector<2x8x8xf32> to vector<2x8xf32>
    %129 = vector.shape_cast %128 : vector<2x8xf32> to vector<2x8x1xf32>
    %130 = vector.broadcast %129 : vector<2x8x1xf32> to vector<2x8x8xf32>
    %131 = arith.subf %127, %130 : vector<2x8x8xf32>
    %132 = math.exp %131 : vector<2x8x8xf32>
    %cst_37 = arith.constant dense<0.000000e+00> : vector<2x8xf32>
    %133 = vector.multi_reduction <add>, %132, %cst_37 [2] : vector<2x8x8xf32> to vector<2x8xf32>
    %134 = vector.shape_cast %133 : vector<2x8xf32> to vector<2x8x1xf32>
    %135 = tpu.reciprocal %134 {approx = true} : vector<2x8x1xf32> -> vector<2x8x1xf32>
    %136 = vector.broadcast %135 : vector<2x8x1xf32> to vector<2x8x8xf32>
    %137 = arith.mulf %132, %136 : vector<2x8x8xf32>
    %138 = arith.truncf %137 : vector<2x8x8xf32> to vector<2x8x8xbf16>
    "tpu.trace_start"() <{level = 10 : i32, message = "bqk,bkd->bqd"}> : () -> ()
    %cst_38 = arith.constant dense<0.000000e+00> : vector<2x8x8xf32>
    %139 = tpu.matmul %138, %124, %cst_38 {dimension_numbers = #tpu.dot_dimension_numbers<[2], [1], [1], [2], [0, 0, 0, 1, 1, 2], [0], [0]>} : vector<2x8x8xbf16>, vector<2x8x8xbf16>, vector<2x8x8xf32> -> vector<2x8x8xf32>
    "tpu.trace_stop"() : () -> ()
    %140 = vector.shape_cast %139 : vector<2x8x8xf32> to vector<16x8xf32>
    %141 = arith.truncf %140 : vector<16x8xf32> to vector<16x8xbf16>
    %142 = vector.extract_strided_slice %24 {offsets = [3, 0, 0], sizes = [1, 8, 32], strides = [1, 1, 1]} : vector<4x8x32xbf16> to vector<1x8x32xbf16>
    %143 = vector.shape_cast %142 : vector<1x8x32xbf16> to vector<8x32xbf16>
    %cst_39 = arith.constant dense<0.000000e+00> : vector<16x32xf32>
    %144 = tpu.matmul %141, %143, %cst_39 {dimension_numbers = #tpu.dot_dimension_numbers<[1], [0], [0], [1], [0, 0, 1, 1], [], []>} : vector<16x8xbf16>, vector<8x32xbf16>, vector<16x32xf32> -> vector<16x32xf32>
    %145 = arith.addf %115, %144 : vector<16x32xf32>
    %c0_40 = arith.constant 0 : index
    %c0_41 = arith.constant 0 : index
    %c0_42 = arith.constant 0 : index
    %146 = vector.load %arg7[%c0_40, %c0_41, %c0_42] : memref<1x1x32xf32, #tpu.memory_space<vmem>>, vector<1x1x32xf32>
    %147 = vector.shape_cast %146 : vector<1x1x32xf32> to vector<1x32xf32>
    %148 = vector.broadcast %147 : vector<1x32xf32> to vector<16x32xf32>
    %149 = arith.addf %145, %148 : vector<16x32xf32>
    %150 = arith.addf %149, %3 : vector<16x32xf32>
    %c0_43 = arith.constant 0 : index
    %c0_44 = arith.constant 0 : index
    %c0_45 = arith.constant 0 : index
    %151 = vector.load %arg8[%c0_43, %c0_44, %c0_45] : memref<1x1x32xf32, #tpu.memory_space<vmem>>, vector<1x1x32xf32>
    %152 = vector.shape_cast %151 : vector<1x1x32xf32> to vector<1x32xf32>
    %c0_46 = arith.constant 0 : index
    %c0_47 = arith.constant 0 : index
    %c0_48 = arith.constant 0 : index
    %153 = vector.load %arg9[%c0_46, %c0_47, %c0_48] : memref<1x1x32xf32, #tpu.memory_space<vmem>>, vector<1x1x32xf32>
    %154 = vector.shape_cast %153 : vector<1x1x32xf32> to vector<1x32xf32>
    %cst_49 = arith.constant dense<0.000000e+00> : vector<16xf32>
    %155 = vector.multi_reduction <add>, %150, %cst_49 [1] : vector<16x32xf32> to vector<16xf32>
    %156 = vector.shape_cast %155 : vector<16xf32> to vector<16x1xf32>
    %cst_50 = arith.constant 3.200000e+01 : f32
    %157 = vector.broadcast %cst_50 : f32 to vector<16x1xf32>
    %158 = arith.divf %156, %157 : vector<16x1xf32>
    %159 = vector.broadcast %158 : vector<16x1xf32> to vector<16x32xf32>
    %160 = arith.subf %150, %159 : vector<16x32xf32>
    %161 = arith.mulf %160, %160 : vector<16x32xf32>
    %cst_51 = arith.constant dense<0.000000e+00> : vector<16xf32>
    %162 = vector.multi_reduction <add>, %161, %cst_51 [1] : vector<16x32xf32> to vector<16xf32>
    %163 = vector.shape_cast %162 : vector<16xf32> to vector<16x1xf32>
    %cst_52 = arith.constant 3.200000e+01 : f32
    %164 = vector.broadcast %cst_52 : f32 to vector<16x1xf32>
    %165 = arith.divf %163, %164 : vector<16x1xf32>
    %166 = vector.broadcast %158 : vector<16x1xf32> to vector<16x32xf32>
    %167 = arith.subf %150, %166 : vector<16x32xf32>
    %cst_53 = arith.constant 9.99999974E-6 : f32
    %168 = vector.broadcast %cst_53 : f32 to vector<16x1xf32>
    %169 = arith.addf %165, %168 : vector<16x1xf32>
    %170 = math.rsqrt %169 : vector<16x1xf32>
    %171 = vector.broadcast %170 : vector<16x1xf32> to vector<16x32xf32>
    %172 = arith.mulf %167, %171 : vector<16x32xf32>
    %173 = vector.broadcast %152 : vector<1x32xf32> to vector<16x32xf32>
    %174 = arith.mulf %172, %173 : vector<16x32xf32>
    %175 = vector.broadcast %154 : vector<1x32xf32> to vector<16x32xf32>
    %176 = arith.addf %174, %175 : vector<16x32xf32>
    %177 = arith.truncf %176 : vector<16x32xf32> to vector<16x32xbf16>
    %c0_54 = arith.constant 0 : index
    %c0_55 = arith.constant 0 : index
    %c0_56 = arith.constant 0 : index
    %178 = vector.load %arg10[%c0_54, %c0_55, %c0_56] : memref<1x32x128xbf16, #tpu.memory_space<vmem>>, vector<1x32x128xbf16>
    %179 = vector.shape_cast %178 : vector<1x32x128xbf16> to vector<32x128xbf16>
    %cst_57 = arith.constant dense<0.000000e+00> : vector<16x128xf32>
    %180 = tpu.matmul %177, %179, %cst_57 {dimension_numbers = #tpu.dot_dimension_numbers<[1], [0], [0], [1], [0, 0, 1, 1], [], []>} : vector<16x32xbf16>, vector<32x128xbf16>, vector<16x128xf32> -> vector<16x128xf32>
    %c0_58 = arith.constant 0 : index
    %c0_59 = arith.constant 0 : index
    %c0_60 = arith.constant 0 : index
    %181 = vector.load %arg11[%c0_58, %c0_59, %c0_60] : memref<1x1x128xf32, #tpu.memory_space<vmem>>, vector<1x1x128xf32>
    %182 = vector.shape_cast %181 : vector<1x1x128xf32> to vector<1x128xf32>
    %183 = vector.broadcast %182 : vector<1x128xf32> to vector<16x128xf32>
    %184 = arith.addf %180, %183 : vector<16x128xf32>
    %cst_61 = arith.constant 0.000000e+00 : f32
    %185 = vector.broadcast %cst_61 : f32 to vector<16x128xf32>
    %186 = arith.maximumf %184, %185 : vector<16x128xf32>
    %187 = arith.truncf %186 : vector<16x128xf32> to vector<16x128xbf16>
    %c0_62 = arith.constant 0 : index
    %c0_63 = arith.constant 0 : index
    %c0_64 = arith.constant 0 : index
    %188 = vector.load %arg12[%c0_62, %c0_63, %c0_64] : memref<1x128x32xbf16, #tpu.memory_space<vmem>>, vector<1x128x32xbf16>
    %189 = vector.shape_cast %188 : vector<1x128x32xbf16> to vector<128x32xbf16>
    %cst_65 = arith.constant dense<0.000000e+00> : vector<16x32xf32>
    %190 = tpu.matmul %187, %189, %cst_65 {dimension_numbers = #tpu.dot_dimension_numbers<[1], [0], [0], [1], [0, 0, 1, 1], [], []>} : vector<16x128xbf16>, vector<128x32xbf16>, vector<16x32xf32> -> vector<16x32xf32>
    %c0_66 = arith.constant 0 : index
    %c0_67 = arith.constant 0 : index
    %c0_68 = arith.constant 0 : index
    %191 = vector.load %arg13[%c0_66, %c0_67, %c0_68] : memref<1x1x32xf32, #tpu.memory_space<vmem>>, vector<1x1x32xf32>
    %192 = vector.shape_cast %191 : vector<1x1x32xf32> to vector<1x32xf32>
    %193 = vector.broadcast %192 : vector<1x32xf32> to vector<16x32xf32>
    %194 = arith.addf %190, %193 : vector<16x32xf32>
    %195 = arith.addf %194, %176 : vector<16x32xf32>
    %c0_69 = arith.constant 0 : index
    %c0_70 = arith.constant 0 : index
    %c0_71 = arith.constant 0 : index
    %196 = vector.load %arg14[%c0_69, %c0_70, %c0_71] : memref<1x1x32xf32, #tpu.memory_space<vmem>>, vector<1x1x32xf32>
    %197 = vector.shape_cast %196 : vector<1x1x32xf32> to vector<1x32xf32>
    %c0_72 = arith.constant 0 : index
    %c0_73 = arith.constant 0 : index
    %c0_74 = arith.constant 0 : index
    %198 = vector.load %arg15[%c0_72, %c0_73, %c0_74] : memref<1x1x32xf32, #tpu.memory_space<vmem>>, vector<1x1x32xf32>
    %199 = vector.shape_cast %198 : vector<1x1x32xf32> to vector<1x32xf32>
    %cst_75 = arith.constant dense<0.000000e+00> : vector<16xf32>
    %200 = vector.multi_reduction <add>, %195, %cst_75 [1] : vector<16x32xf32> to vector<16xf32>
    %201 = vector.shape_cast %200 : vector<16xf32> to vector<16x1xf32>
    %cst_76 = arith.constant 3.200000e+01 : f32
    %202 = vector.broadcast %cst_76 : f32 to vector<16x1xf32>
    %203 = arith.divf %201, %202 : vector<16x1xf32>
    %204 = vector.broadcast %203 : vector<16x1xf32> to vector<16x32xf32>
    %205 = arith.subf %195, %204 : vector<16x32xf32>
    %206 = arith.mulf %205, %205 : vector<16x32xf32>
    %cst_77 = arith.constant dense<0.000000e+00> : vector<16xf32>
    %207 = vector.multi_reduction <add>, %206, %cst_77 [1] : vector<16x32xf32> to vector<16xf32>
    %208 = vector.shape_cast %207 : vector<16xf32> to vector<16x1xf32>
    %cst_78 = arith.constant 3.200000e+01 : f32
    %209 = vector.broadcast %cst_78 : f32 to vector<16x1xf32>
    %210 = arith.divf %208, %209 : vector<16x1xf32>
    %211 = vector.broadcast %203 : vector<16x1xf32> to vector<16x32xf32>
    %212 = arith.subf %195, %211 : vector<16x32xf32>
    %cst_79 = arith.constant 9.99999974E-6 : f32
    %213 = vector.broadcast %cst_79 : f32 to vector<16x1xf32>
    %214 = arith.addf %210, %213 : vector<16x1xf32>
    %215 = math.rsqrt %214 : vector<16x1xf32>
    %216 = vector.broadcast %215 : vector<16x1xf32> to vector<16x32xf32>
    %217 = arith.mulf %212, %216 : vector<16x32xf32>
    %218 = vector.broadcast %197 : vector<1x32xf32> to vector<16x32xf32>
    %219 = arith.mulf %217, %218 : vector<16x32xf32>
    %220 = vector.broadcast %199 : vector<1x32xf32> to vector<16x32xf32>
    %221 = arith.addf %219, %220 : vector<16x32xf32>
    %c0_80 = arith.constant 0 : index
    %c0_81 = arith.constant 0 : index
    %222 = vector.load %arg17[%c0_80, %c0_81] : memref<16x32xf32, #tpu.memory_space<vmem>>, vector<16x32xf32>
    tpu.vector_store %arg17[%c0_80, %c0_81], %221 {strides = array<i32>} : memref<16x32xf32, #tpu.memory_space<vmem>>, vector<16x32xf32>,
    %c1_i32 = arith.constant 1 : i32
    %223 = arith.cmpi eq, %arg1, %c1_i32 : i32
    %224 = arith.extui %223 : i1 to i32
    %c0_i32_82 = arith.constant 0 : i32
    %225 = arith.cmpi ne, %224, %c0_i32_82 : i32
    scf.if %225 {
      %226 = vector.shape_cast %221 : vector<16x32xf32> to vector<2x8x32xf32>
      %c0_83 = arith.constant 0 : index
      %c0_84 = arith.constant 0 : index
      %c0_85 = arith.constant 0 : index
      %227 = vector.load %arg16[%c0_83, %c0_84, %c0_85] : memref<2x8x32xf32, #tpu.memory_space<vmem>>, vector<2x8x32xf32>
      tpu.vector_store %arg16[%c0_83, %c0_84, %c0_85], %226 {strides = array<i32>} : memref<2x8x32xf32, #tpu.memory_space<vmem>>, vector<2x8x32xf32>,
    } else {
    }
    return
  }
  func.func @transform_0(%arg0: i32, %arg1: i32) -> (i32, i32, i32) {
    %c0_i32 = arith.constant 0 : i32
    %c0_i32_0 = arith.constant 0 : i32
    %c0_i32_1 = arith.constant 0 : i32
    return %arg0, %c0_i32, %c0_i32_0 : i32, i32, i32
  }
  func.func @transform_1(%arg0: i32, %arg1: i32) -> (i32, i32, i32) {
    %c0_i32 = arith.constant 0 : i32
    %c0_i32_0 = arith.constant 0 : i32
    %c0_i32_1 = arith.constant 0 : i32
    return %arg0, %c0_i32, %c0_i32_0 : i32, i32, i32
  }
  func.func @transform_2(%arg0: i32, %arg1: i32) -> (i32, i32, i32) {
    %c0_i32 = arith.constant 0 : i32
    %c0_i32_0 = arith.constant 0 : i32
    %c0_i32_1 = arith.constant 0 : i32
    return %arg1, %c0_i32, %c0_i32_0 : i32, i32, i32
  }
  func.func @transform_3(%arg0: i32, %arg1: i32) -> (i32, i32, i32) {
    %c0_i32 = arith.constant 0 : i32
    %c0_i32_0 = arith.constant 0 : i32
    %c0_i32_1 = arith.constant 0 : i32
    return %arg1, %c0_i32, %c0_i32_0 : i32, i32, i32
  }
  func.func @transform_4(%arg0: i32, %arg1: i32) -> (i32, i32, i32, i32) {
    %c0_i32 = arith.constant 0 : i32
    %c0_i32_0 = arith.constant 0 : i32
    %c0_i32_1 = arith.constant 0 : i32
    %c0_i32_2 = arith.constant 0 : i32
    return %arg1, %c0_i32, %c0_i32_0, %c0_i32_1 : i32, i32, i32, i32
  }
  func.func @transform_5(%arg0: i32, %arg1: i32) -> (i32, i32, i32) {
    %c0_i32 = arith.constant 0 : i32
    %c0_i32_0 = arith.constant 0 : i32
    %c0_i32_1 = arith.constant 0 : i32
    return %arg1, %c0_i32, %c0_i32_0 : i32, i32, i32
  }
  func.func @transform_6(%arg0: i32, %arg1: i32) -> (i32, i32, i32) {
    %c0_i32 = arith.constant 0 : i32
    %c0_i32_0 = arith.constant 0 : i32
    %c0_i32_1 = arith.constant 0 : i32
    return %arg1, %c0_i32, %c0_i32_0 : i32, i32, i32
  }
  func.func @transform_7(%arg0: i32, %arg1: i32) -> (i32, i32, i32) {
    %c0_i32 = arith.constant 0 : i32
    %c0_i32_0 = arith.constant 0 : i32
    %c0_i32_1 = arith.constant 0 : i32
    return %arg1, %c0_i32, %c0_i32_0 : i32, i32, i32
  }
  func.func @transform_8(%arg0: i32, %arg1: i32) -> (i32, i32, i32) {
    %c0_i32 = arith.constant 0 : i32
    %c0_i32_0 = arith.constant 0 : i32
    %c0_i32_1 = arith.constant 0 : i32
    return %arg1, %c0_i32, %c0_i32_0 : i32, i32, i32
  }
  func.func @transform_9(%arg0: i32, %arg1: i32) -> (i32, i32, i32) {
    %c0_i32 = arith.constant 0 : i32
    %c0_i32_0 = arith.constant 0 : i32
    %c0_i32_1 = arith.constant 0 : i32
    return %arg1, %c0_i32, %c0_i32_0 : i32, i32, i32
  }
  func.func @transform_10(%arg0: i32, %arg1: i32) -> (i32, i32, i32) {
    %c0_i32 = arith.constant 0 : i32
    %c0_i32_0 = arith.constant 0 : i32
    %c0_i32_1 = arith.constant 0 : i32
    return %arg1, %c0_i32, %c0_i32_0 : i32, i32, i32
  }
  func.func @transform_11(%arg0: i32, %arg1: i32) -> (i32, i32, i32) {
    %c0_i32 = arith.constant 0 : i32
    %c0_i32_0 = arith.constant 0 : i32
    %c0_i32_1 = arith.constant 0 : i32
    return %arg1, %c0_i32, %c0_i32_0 : i32, i32, i32
  }
  func.func @transform_12(%arg0: i32, %arg1: i32) -> (i32, i32, i32) {
    %c0_i32 = arith.constant 0 : i32
    %c0_i32_0 = arith.constant 0 : i32
    %c0_i32_1 = arith.constant 0 : i32
    return %arg1, %c0_i32, %c0_i32_0 : i32, i32, i32
  }
  func.func @transform_13(%arg0: i32, %arg1: i32) -> (i32, i32, i32) {
    %c0_i32 = arith.constant 0 : i32
    %c0_i32_0 = arith.constant 0 : i32
    %c0_i32_1 = arith.constant 0 : i32
    return %arg1, %c0_i32, %c0_i32_0 : i32, i32, i32
  }
  func.func @transform_14(%arg0: i32, %arg1: i32) -> (i32, i32, i32) {
    %c0_i32 = arith.constant 0 : i32
    %c0_i32_0 = arith.constant 0 : i32
    %c0_i32_1 = arith.constant 0 : i32
    return %arg0, %c0_i32, %c0_i32_0 : i32, i32, i32
  }
}

</mosaic_0001>

<bundles_post_ra>
// kernel: tpu_custom_call.1
= control target key start
LH: loop header
LB: loop body
LE: loop exit
PB: predicated region body
PF: predicated region fallthrough
CT: control target
= control target key end

     0   :  { %s2407_s0 = inlined_call_operand.vmem [shape: f32[2,8,32], index: 0, kind: input, shape index: {}]   ;;  %s2408_s1 = inlined_call_operand.vmem [shape: f32[2,1,8], index: 1, kind: input, shape index: {}]   ;;  %s2409_s2 = inlined_call_operand.vmem [shape: bf16[2,32,96], index: 2, kind: input, shape index: {}]   ;;  %s2410_s3 = inlined_call_operand.vmem [shape: f32[2,1,96], index: 3, kind: input, shape index: {}]   ;;  %s2411_s4 = inlined_call_operand.vmem [shape: bf16[2,4,8,32], index: 4, kind: input, shape index: {}]   ;;  %s2412_s5 = inlined_call_operand.vmem [shape: f32[2,1,32], index: 5, kind: input, shape index: {}]   ;;  %s2413_s6 = inlined_call_operand.vmem [shape: f32[2,1,32], index: 6, kind: input, shape index: {}]   ;;  %s2414_s7 = inlined_call_operand.vmem [shape: f32[2,1,32], index: 7, kind: input, shape index: {}]   ;;  %s2415_s8 = inlined_call_operand.vmem [shape: bf16[2,32,128], index: 8, kind: input, shape index: {}]   ;;  %s2416_s9 = inlined_call_operand.vmem [shape: f32[2,1,128], index: 9, kind: input, shape index: {}]   ;;  %s2417_s10 = inlined_call_operand.vmem [shape: bf16[2,128,32], index: 10, kind: input, shape index: {}]   ;;  %s2418_s11 = inlined_call_operand.vmem [shape: f32[2,1,32], index: 11, kind: input, shape index: {}]   ;;  %s2419_s12 = inlined_call_operand.vmem [shape: f32[2,1,32], index: 12, kind: input, shape index: {}]   ;;  %s2420_s13 = inlined_call_operand.vmem [shape: f32[2,1,32], index: 13, kind: input, shape index: {}]   ;;  %s2421_s14 = inlined_call_operand.hbm [shape: f32[2,8,32], index: 14, kind: output, shape index: {}]  }
   0x1   :  { %2426 = sst [smem:[#allocation9_spill]] %s2407_s0 }
   0x2   :  { %2427 = sst [smem:[#allocation10_spill]] %s2408_s1 }
   0x3   :  { %2428 = sst [smem:[#allocation11_spill]] %s2409_s2 }
   0x4   :  { %2429 = sst [smem:[#allocation12_spill]] %s2410_s3 }
   0x5   :  { %2430 = sst [smem:[#allocation13_spill]] %s2411_s4 }
   0x6   :  { %2431 = sst [smem:[#allocation14_spill]] %s2421_s14 }
   0x7   :  { %19 = vsyncpa [#allocation4], 0  ;;  %s2112_s29 = smov 0   ;;  %s2114_s30 = smov 0  }
   0x8   :  { %s2116_s15 = smov 0  }
   0x9 LB: > { %2432 = sst [smem:[#allocation6_spill]] %s2015_s30  ;;  %s34_s17 = sadd.s32 1, %s2015_s30  ;;  %s2019_s15 = sphi %s2116_s15, %s25_s15   ;;  %s2015_s30 = sphi %s2114_s30, %s2448_s30   ;;  %s2011_s29 = sphi %s2112_s29, %s2447_s29  }
   0xa   : > { %2433 = sst [smem:[#allocation7_spill]] %s2019_s15  ;;  %p35_p0 = scmp.ge.s32.totalorder %s34_s17, 2 }
   0xb   : > { %p1768_p1 = scmp.ge.s32.totalorder %s2019_s15, 1  ;;  %p540_p2 = scmp.lt.s32.totalorder %s2019_s15, 3 }
   0xc   : > { %s2450_s17 = smov (%p35_p0, %s34_s17), 0 }
   0xd   : > { %2434 = sst [smem:[#allocation8_spill]] %s2450_s17  ;;  %p541_p3 = pnand %p1768_p1, %p540_p2 }
   0xe   : > { %p640_p4 = scmp.lt.s32.totalorder (!%p541_p3), %s2011_s29, 1  ;;  %s2435_s3 = sld [smem:[#allocation12_spill]] (!%p541_p3) }
   0xf   : > { %544 = sbr.rel (%p541_p3) target bundleno = 2603 (0xa2b), region = 76  ;;  %s2436_s2 = sld [smem:[#allocation11_spill]] (!%p541_p3) }
  0x10   : > { %s2437_s4 = sld [smem:[#allocation13_spill]] (!%p541_p3)  ;;  %p1777_p5 = scmp.ne.s32.totalorder (!%p541_p3), %s2011_s29, 0 }
  0x14   : > { %s2135_s18 = scalar_select %p640_p4, %s2011_s29, 1 }
  0x15   : > { %s2438_s16 = sld [smem:[#allocation9_spill]] (!%p1777_p5) }
  0x16   : > { %s1853_s19 = sshll.u32 %s2135_s18, 4  ;;  %s647_s22 = scalar_lea.vmem %s2435_s3, %s2135_s18 }
  0x17   : > { %s644_s25 = scalar_lea.vmem %s2436_s2, %s1853_s19  ;;  %s2148_s28 = scalar_lea.vmem %s2437_s4, %s1853_s19 }
  0x18   : > { %s2165_s24 = scalar_lea.vmem %s2415_s8, %s1853_s19  ;;  %s669_s2 = scalar_lea.vmem %s2416_s9, %s2135_s18 }
  0x19   : > { %s1856_s4 = sshll.u32 %s2135_s18, 6  ;;  %s677_s0 = scalar_lea.vmem %s2418_s11, %s2135_s18 }
  0x1a   : > { %s2175_s30 = scalar_lea.vmem %s2417_s10, %s1856_s4  ;;  %s680_s3 = scalar_lea.vmem %s2419_s12, %s2135_s18 }
  0x1b   : > { %s683_s1 = scalar_lea.vmem %s2420_s13, %s2135_s18  ;;  %689 = sbr.rel (%p1777_p5) target bundleno = 35 (0x23), region = 80 }
  0x20   : > { %v690_v0 = vld [vmem:[%s2438_s16] sm:$0xff]  ;;  %vm692_vm0 = vcmask 261120   ;;  %v691_v1 = vld [vmem:[%s2438_s16 + $0x8] sm:$0xff] }
  0x21   : > { %693 = vst.msk [vmem:[#allocation2] sm:$0xff] %vm692_vm0, %v690_v0 }
  0x22   : > { %694 = vst.msk [vmem:[#allocation2 + $0x8] sm:$0xff] %vm692_vm0, %v691_v1 }
  0x23 PF: > { %v1858_v2 = vld [vmem:[%s644_s25 + $0x8] sm:$0xff]  ;;  %v1857_v3 = vld [vmem:[%s644_s25] sm:$0xff]  ;;  %vm718_vm1 = vcmask 261120   ;;  %s2021_s25 = smov 96   ;;  %s2022_s21 = smov 88   ;;  %vm763_vm2 = vcmask 64512  }
  0x24   : > { %728 = vmatpush.bf16.msra.mxu0 %v1858_v2  ;;  %v1915_v7 = vld [vmem:[%s647_s22] ss:$0 sm:$0xff]  ;;  %s2023_s22 = smov 120   ;;  %s2024_s14 = smov 56   ;;  %vm836_vm3 = vcmask 1043456   ;;  %v2025_v41 = vmov 0.0  }
  0x25   : > { %s2439_s19 = sld [smem:[#allocation10_spill]]  ;;  %s2026_s27 = smov 80  }
  0x26   : > { %s2027_s4 = smov 64   ;;  %s2028_s17 = smov 112  }
  0x27   : > { %s2440_s23 = scalar_lea.vmem %s2412_s5, %s2135_s18  ;;  %s2441_s26 = scalar_lea.vmem %s2413_s6, %s2135_s18 }
  0x28   : > { %v2196_v4 = vld [vmem:[#allocation2] sm:$0xff]  ;;  %729 = vmatpush.bf16.msra.mxu0 %v1857_v3  ;;  %p1848_p6 = scmp.ne.s32.totalorder %s2011_s29, 1 }
  0x29   : > { %v2198_v5 = vld [vmem:[#allocation2 + $0x8] sm:$0xff] }
  0x2a   : > { %v697_v6 = vpack.c.bf16 %v2198_v5, %v2196_v4 }
  0x2b   : > { %v738_v39 = vld [vmem:[%s2439_s19] sm:$0x1]  ;;  %v739_v51 = vld [vmem:[%s2439_s19 + $0x1] sm:$0x1] }
  0x2c   : > { %1786 = vmatmul.msk.bf16.vlgmr.msra.gmra.mxu0 %vm718_vm1, %v697_v6  ;;  %vm740_vm4 = vcmp.eq.f32.partialorder %v738_v39, 0.0  ;;  %vm741_vm5 = vcmp.eq.f32.partialorder %v739_v51, 0.0 }
  0x2d   : > { %v742_v42 = vsel %vm740_vm4, -1e+09, %v2025_v41  ;;  %v743_v53 = vsel %vm741_vm5, -1e+09, %v2025_v41 }
  0x2e   : > { %v2231_v43 = vperm.slane %v742_v42, 0  ;;  %v2240_v54 = vperm.slane %v743_v53, 0 }
  0xa9   : > { %v731_v8 = vpop.f32.mrf.mxu0 }
  0xaa   : > { %v732_v9 = vadd.f32 %v1915_v7, %v731_v8 }
  0xac   : > { %v750_v10 = vpack.c.bf16 %v732_v9, %v732_v9  ;;  %v736_v11 = vmul.f32 0.35355338, %v732_v9 }
  0xae   : > { %v759_v12 = vunpack.c.l.b16 %v750_v10  ;;  %v748_v14 = vpack.c.bf16 %v736_v11, %v736_v11 }
  0xb0   : > { %v2203_v13 = vpack.c.b16 %v759_v12, %v759_v12  ;;  %v876_v19 = vunpack.c.l.b16 %v748_v14 }
  0xb1   : > { %v733_v15 = vpop.f32.mrf.mxu0 }
  0xb2   : > { %v734_v16 = vadd.f32 %v1915_v7, %v733_v15  ;;  %761 = vrot.lane.b32.xlu1 %v2203_v13, %s2021_s25  ;;  %880 = vrot.lane.b32.xlu0 %v2203_v13, %s2022_s21  ;;  %v2209_v23 = vpack.c.b16 %v876_v19, %v876_v19 }
  0xb4   : > { %v737_v17 = vmul.f32 0.35355338, %v734_v16  ;;  %v751_v18 = vpack.c.bf16 %v734_v16, %v734_v16 }
  0xb6   : > { %v784_v20 = vunpack.c.l.b16 %v751_v18  ;;  %v749_v21 = vpack.c.bf16 %v737_v17, %v737_v17 }
  0xb8   : > { %v2207_v22 = vpack.c.b16 %v784_v20, %v784_v20  ;;  %v902_v24 = vunpack.c.l.b16 %v749_v21 }
  0xba   : > { %906 = vrot.lane.b32.xlu2 %v2207_v22, %s2022_s21  ;;  %786 = vrot.lane.b32.xlu1 %v2207_v22, %s2021_s25  ;;  %v2214_v25 = vpack.c.b16 %v902_v24, %v902_v24  ;;  %s2029_s25 = smov 48   ;;  %s2030_s21 = smov 72  }
  0xbb   : > { %878 = vrot.lane.b32.xlu0 %v2209_v23, %s2023_s22 }
  0xc2   : > { %904 = vrot.lane.b32.xlu2 %v2214_v25, %s2023_s22  ;;  %s2031_s22 = smov 104  }
  0xca   : > { %951 = vrot.lane.b32.xlu2 %v2203_v13, %s2024_s14 }
 0x114   : > { %v907_v26 = vpop.permute.xlu2 %906 }
 0x115   : > { %v912_v27 = vsel %vm763_vm2, %v907_v26, 0 }
 0x116   : > { %921 = vmatpush.bf16.xpose.msra.mxu1 %v912_v27 }
 0x11c   : > { %v905_v28 = vpop.permute.xlu2 %904 }
 0x11d   : > { %1792 = vmatmul.msk.bf16.vlgmr.msra.gmra.mxu1 %vm763_vm2, %v905_v28 }
 0x124   : > { %v762_v29 = vpop.permute.xlu1 %761  ;;  %v881_v30 = vpop.permute.xlu0 %880 }
 0x125   : > { %v768_v31 = vsel %vm763_vm2, %v762_v29, 0  ;;  %v886_v32 = vsel %vm763_vm2, %v881_v30, 0  ;;  %v952_v33 = vpop.permute.xlu2 %951 }
 0x126   : > { %777 = vmatpush.bf16.xpose.msra.mxu2 %v768_v31  ;;  %895 = vmatpush.bf16.xpose.msrb.mxu0 %v886_v32  ;;  %v957_v37 = vsel %vm836_vm3, %v952_v33, 0  ;;  %v745_v31 = vld [vmem:[%s2148_s28 + $0x4] sm:$0xf] }
 0x127   : > { %v998_v32 = vsel %vm836_vm3, %v745_v31, 0 }
 0x12c   : > { %v787_v34 = vpop.permute.xlu1 %786 }
 0x12d   : > { %v879_v35 = vpop.permute.xlu0 %878  ;;  %1787 = vmatmul.msk.bf16.vlgmr.msra.gmra.mxu2 %vm763_vm2, %v748_v14  ;;  %v792_v36 = vsel %vm763_vm2, %v787_v34, 0 }
 0x12e   : > { %1791 = vmatmul.msk.bf16.vlgmr.msrb.gmra.mxu0 %vm763_vm2, %v879_v35  ;;  %801 = vmatpush.bf16.xpose.msrb.mxu2 %v792_v36 }
 0x12f   : > { %1007 = vmatpush.bf16.msra.mxu0 %v998_v32 }
 0x136   : > { %966 = vmatpush.bf16.msra.mxu2 %v957_v37 }
 0x13d   : > { %1788 = vmatmul.msk.bf16.vlgmr.msrb.gmra.mxu2 %vm763_vm2, %v749_v21 }
 0x19a   : > { %v923_v38 = vpop.f32.mrf.mxu1 }
 0x19b   : > { %v924_v58 = vadd.f32 %v923_v38, %v2240_v54 }
 0x19d   : > { %v930_v60 = vsel %vm763_vm2, %v924_v58, -inf }
 0x1a2   : > { %v925_v40 = vpop.f32.mrf.mxu1 }
 0x1ab   : > { %v897_v44 = vpop.f32.mrf.mxu0 }
 0x1ac   : > { %v898_v45 = vadd.f32 %v897_v44, %v2231_v43 }
 0x1ae   : > { %v927_v46 = vsel %vm763_vm2, %v898_v45, -inf }
 0x1af   : > { %928 = vmax.xlane.f32.xlu0 %v927_v46 }
 0x1b0   : > { %v779_v47 = vpop.f32.mrf.mxu2 }
 0x1b1   : > { %v780_v48 = vadd.f32 %v779_v47, %v2231_v43 }
 0x1b3   : > { %v899_v49 = vpop.f32.mrf.mxu0  ;;  %v807_v50 = vsel %vm763_vm2, %v780_v48, -inf }
 0x1b4   : > { %808 = vmax.xlane.f32.xlu2 %v807_v50 }
 0x1b8   : > { %v781_v52 = vpop.f32.mrf.mxu2 }
 0x1c0   : > { %v803_v55 = vpop.f32.mrf.mxu2 }
 0x1c1   : > { %v804_v56 = vadd.f32 %v803_v55, %v2240_v54 }
 0x1c3   : > { %1036 = vrot.lane.b32.xlu0 %v2203_v13, %s2026_s27  ;;  %v810_v57 = vsel %vm763_vm2, %v804_v56, -inf }
 0x1c4   : > { %811 = vmax.xlane.f32.xlu2 %v810_v57 }
 0x1c8   : > { %v805_v59 = vpop.f32.mrf.mxu2 }
 0x1cc   : > { %931 = vmax.xlane.f32.xlu2 %v930_v60 }
 0x1e4   : > { %831 = vrot.lane.b32.xlu2 %v2203_v13, %s2027_s4 }
 0x1ec   : > { %853 = vrot.lane.b32.xlu2 %v2207_v22, %s2027_s4 }
 0x222   : > { %v929_v61 = vpop.xlane.xlu0 %928 }
 0x223   : > { %v933_v62 = vsub.f32 %v898_v45, %v929_v61 }
 0x225   : > { %v935_v63 = vmul.f32 1.442695, %v933_v62 }
 0x227   : > { %1923 = vpow2.f32 %v935_v63  ;;  %v809_v0 = vpop.xlane.xlu2 %808 }
 0x228   : > { %v813_v1 = vsub.f32 %v780_v48, %v809_v0 }
 0x22a   : > { %v815_v2 = vmul.f32 1.442695, %v813_v1 }
 0x22c   : > { %1925 = vpow2.f32 %v815_v2 }
 0x22d   : > { %v1924_v3 = vpop.eup %1923 }
 0x22e   : > { %v939_v6 = vsel %vm763_vm2, %v1924_v3, 0.0 }
 0x22f   : > { %940 = vadd.xlane.f32.xlu1 %v939_v6 }
 0x232   : > { %v1926_v7 = vpop.eup %1925 }
 0x233   : > { %v819_v8 = vsel %vm763_vm2, %v1926_v7, 0.0 }
 0x234   : > { %820 = vadd.xlane.f32.xlu0 %v819_v8 }
 0x235   : > { %v1037_v9 = vpop.permute.xlu0 %1036 }
 0x236   : > { %v1042_v10 = vsel %vm763_vm2, %v1037_v9, 0 }
 0x237   : > { %1051 = vmatpush.bf16.xpose.msrb.mxu2 %v1042_v10  ;;  %v812_v11 = vpop.xlane.xlu2 %811 }
 0x238   : > { %v814_v24 = vsub.f32 %v804_v56, %v812_v11 }
 0x23a   : > { %v817_v26 = vmul.f32 1.442695, %v814_v24 }
 0x23f   : > { %v932_v12 = vpop.xlane.xlu2 %931 }
 0x240   : > { %v934_v14 = vsub.f32 %v924_v58, %v932_v12 }
 0x242   : > { %v937_v15 = vmul.f32 1.442695, %v934_v14 }
 0x244   : > { %1927 = vpow2.f32 %v937_v15 }
 0x245   : > { %1929 = vpow2.f32 %v817_v26 }
 0x247   : > { %v832_v16 = vpop.permute.xlu2 %831 }
 0x248   : > { %1034 = vrot.lane.b32.xlu1 %v2209_v23, %s2028_s17  ;;  %972 = vrot.lane.b32.xlu0 %v2207_v22, %s2024_s14  ;;  %v838_v17 = vsel %vm836_vm3, %v832_v16, 0  ;;  %s2032_s14 = smov 40  }
 0x249   : > { %847 = vmatpush.bf16.msra.mxu3 %v838_v17 }
 0x24a   : > { %v1928_v18 = vpop.eup %1927 }
 0x24b   : > { %v942_v19 = vsel %vm763_vm2, %v1928_v18, 0.0  ;;  %v1930_v27 = vpop.eup %1929 }
 0x24c   : > { %943 = vadd.xlane.f32.xlu2 %v942_v19  ;;  %v822_v28 = vsel %vm763_vm2, %v1930_v27, 0.0 }
 0x24f   : > { %v854_v20 = vpop.permute.xlu2 %853 }
 0x250   : > { %1057 = vrot.lane.b32.xlu0 %v2214_v25, %s2028_s17  ;;  %v859_v21 = vsel %vm836_vm3, %v854_v20, 0  ;;  %s2442_s17 = scalar_lea.vmem %s2414_s7, %s2135_s18 }
 0x251   : > { %868 = vmatpush.bf16.msrb.mxu3 %v859_v21 }
 0x264   : > { %1104 = vrot.lane.b32.xlu2 %v2203_v13, %s2029_s25 }
 0x26c   : > { %1171 = vrot.lane.b32.xlu2 %v2203_v13, %s2030_s21 }
 0x272   : > { %823 = vadd.xlane.f32.xlu1 %v822_v28 }
 0x274   : > { %1194 = vrot.lane.b32.xlu2 %v2207_v22, %s2030_s21 }
 0x28b   : > { %1059 = vrot.lane.b32.xlu1 %v2207_v22, %s2026_s27 }
 0x2a2   : > { %v941_v29 = vpop.xlane.xlu1 %940 }
 0x2a3   : > { %1931 = vrcp.f32 %v941_v29 }
 0x2a7   : > { %v821_v30 = vpop.xlane.xlu0 %820 }
 0x2a8   : > { %1933 = vrcp.f32 %v821_v30 }
 0x2a9   : > { %v1932_v33 = vpop.eup %1931 }
 0x2aa   : > { %v947_v34 = vmul.f32 %v1932_v33, %v1924_v3  ;;  %v744_v3 = vld [vmem:[%s2148_s28] sm:$0xf] }
 0x2ab   : > { %v1018_v6 = vsel %vm836_vm3, %v744_v3, 0 }
 0x2ac   : > { %v949_v35 = vpack.c.bf16 %v947_v34, %v947_v34  ;;  %1027 = vmatpush.bf16.msrb.mxu1 %v1018_v6 }
 0x2ae   : > { %v1934_v36 = vpop.eup %1933  ;;  %1793 = vmatmul.msk.bf16.vlgmr.msra.gmra.mxu2 %vm763_vm2, %v949_v35 }
 0x2af   : > { %v827_v37 = vmul.f32 %v1934_v36, %v1926_v7 }
 0x2b1   : > { %v829_v38 = vpack.c.bf16 %v827_v37, %v827_v37 }
 0x2b3   : > { %1789 = vmatmul.msk.bf16.vlgmr.msra.gmra.mxu3 %vm763_vm2, %v829_v38 }
 0x2ba   : > { %v973_v39 = vpop.permute.xlu0 %972  ;;  %v1035_v41 = vpop.permute.xlu1 %1034 }
 0x2bb   : > { %v978_v40 = vsel %vm836_vm3, %v973_v39, 0 }
 0x2bc   : > { %987 = vmatpush.bf16.msra.mxu3 %v978_v40 }
 0x2be   : > { %1797 = vmatmul.msk.bf16.vlgmr.msrb.gmra.mxu2 %vm763_vm2, %v1035_v41 }
 0x2bf   : > { %v944_v42 = vpop.xlane.xlu2 %943 }
 0x2c2   : > { %v1058_v58 = vpop.permute.xlu0 %1057 }
 0x2c7   : > { %v1105_v44 = vpop.permute.xlu2 %1104 }
 0x2c8   : > { %v1110_v45 = vsel %vm836_vm3, %v1105_v44, 0 }
 0x2c9   : > { %1119 = vmatpush.bf16.msrb.mxu0 %v1110_v45 }
 0x2cf   : > { %v1172_v53 = vpop.permute.xlu2 %1171 }
 0x2d0   : > { %v1177_v57 = vsel %vm763_vm2, %v1172_v53, 0 }
 0x2d7   : > { %v1195_v10 = vpop.permute.xlu2 %1194 }
 0x2d8   : > { %v1200_v14 = vsel %vm763_vm2, %v1195_v10, 0 }
 0x2e5   : > { %v824_v46 = vpop.xlane.xlu1 %823 }
 0x2e6   : > { %1935 = vrcp.f32 %v824_v46  ;;  %v746_v46 = vld [vmem:[%s2148_s28 + $0x8] sm:$0xf] }
 0x2e7   : > { %1937 = vrcp.f32 %v944_v42 }
 0x2ec   : > { %v1936_v47 = vpop.eup %1935 }
 0x2ed   : > { %v828_v48 = vmul.f32 %v1936_v47, %v1930_v27  ;;  %v1938_v50 = vpop.eup %1937  ;;  %v1151_v47 = vsel %vm836_vm3, %v746_v46, 0  ;;  %v2033_v46 = vmov 32.0  }
 0x2ee   : > { %v948_v51 = vmul.f32 %v1938_v50, %v1928_v18  ;;  %1160 = vmatpush.bf16.msra.mxu2 %v1151_v47 }
 0x2ef   : > { %v830_v49 = vpack.c.bf16 %v828_v48, %v828_v48 }
 0x2f0   : > { %v950_v56 = vpack.c.bf16 %v948_v51, %v948_v51 }
 0x2f1   : > { %1790 = vmatmul.msk.bf16.vlgmr.msrb.gmra.mxu3 %vm763_vm2, %v830_v49 }
 0x2fd   : > { %v1060_v52 = vpop.permute.xlu1 %1059 }
 0x2fe   : > { %v1065_v55 = vsel %vm763_vm2, %v1060_v52, 0 }
 0x2ff   : > { %1074 = vmatpush.bf16.xpose.msrb.mxu3 %v1065_v55 }
 0x301   : > { %1794 = vmatmul.msk.bf16.vlgmr.msra.gmra.mxu3 %vm763_vm2, %v950_v56 }
 0x307   : > { %1186 = vmatpush.bf16.xpose.msra.mxu3 %v1177_v57 }
 0x311   : > { %1798 = vmatmul.msk.bf16.vlgmr.msrb.gmra.mxu3 %vm763_vm2, %v1058_v58 }
 0x331   : > { %v968_v59 = vpop.f32.mrf.mxu2 }
 0x336   : > { %v849_v60 = vpop.f32.mrf.mxu3 }
 0x339   : > { %v970_v61 = vpop.f32.mrf.mxu2 }
 0x33e   : > { %v851_v62 = vpop.f32.mrf.mxu3 }
 0x341   : > { %v1053_v63 = vpop.f32.mrf.mxu2 }
 0x342   : > { %v1054_v0 = vadd.f32 %v1053_v63, %v2231_v43 }
 0x344   : > { %v1080_v1 = vsel %vm763_vm2, %v1054_v0, -inf }
 0x345   : > { %1081 = vmax.xlane.f32.xlu0 %v1080_v1 }
 0x349   : > { %v1055_v2 = vpop.f32.mrf.mxu2 }
 0x359   : > { %1169 = vrot.lane.b32.xlu0 %v2209_v23, %s2031_s22 }
 0x374   : > { %v870_v7 = vpop.f32.mrf.mxu3 }
 0x375   : > { %v874_v8 = vpack.c.bf16 %v870_v7, %v849_v60 }
 0x377   : > { %1796 = vmatmul.msk.bf16.vlgmr.msrb.gmra.mxu1 %vm763_vm2, %v874_v8 }
 0x37c   : > { %v872_v9 = vpop.f32.mrf.mxu3 }
 0x384   : > { %v989_v11 = vpop.f32.mrf.mxu3 }
 0x385   : > { %v993_v12 = vpack.c.bf16 %v989_v11, %v968_v59 }
 0x387   : > { %1795 = vmatmul.msk.bf16.vlgmr.msra.gmra.mxu0 %vm763_vm2, %v993_v12 }
 0x388   : > { %1209 = vmatpush.bf16.xpose.msra.mxu0 %v1200_v14 }
 0x38c   : > { %v991_v15 = vpop.f32.mrf.mxu3 }
 0x394   : > { %v1076_v16 = vpop.f32.mrf.mxu3 }
 0x395   : > { %v1077_v17 = vadd.f32 %v1076_v16, %v2240_v54 }
 0x397   : > { %v1083_v18 = vsel %vm763_vm2, %v1077_v17, -inf }
 0x398   : > { %1084 = vmax.xlane.f32.xlu2 %v1083_v18 }
 0x39c   : > { %v1078_v23 = vpop.f32.mrf.mxu3 }
 0x3b8   : > { %v1082_v19 = vpop.xlane.xlu0 %1081 }
 0x3b9   : > { %v1086_v20 = vsub.f32 %v1054_v0, %v1082_v19 }
 0x3bb   : > { %v1088_v21 = vmul.f32 1.442695, %v1086_v20 }
 0x3bd   : > { %1939 = vpow2.f32 %v1088_v21 }
 0x3c3   : > { %v1940_v24 = vpop.eup %1939 }
 0x3c4   : > { %v1092_v26 = vsel %vm763_vm2, %v1940_v24, 0.0 }
 0x3c5   : > { %1093 = vadd.xlane.f32.xlu1 %v1092_v26 }
 0x3cb   : > { %v1170_v27 = vpop.permute.xlu0 %1169 }
 0x3cc   : > { %1802 = vmatmul.msk.bf16.vlgmr.msra.gmra.mxu3 %vm763_vm2, %v1170_v27 }
 0x3de   : > { %1192 = vrot.lane.b32.xlu1 %v2214_v25, %s2031_s22 }
 0x3e6   : > { %1125 = vrot.lane.b32.xlu1 %v2207_v22, %s2029_s25 }
 0x3f4   : > { %v1029_v28 = vpop.f32.mrf.mxu1 }
 0x3fc   : > { %v1031_v2 = vpop.f32.mrf.mxu1 }
 0x404   : > { %v1009_v29 = vpop.f32.mrf.mxu0 }
 0x405   : > { %v2294_v30 = vadd.f32 %v1029_v28, %v1009_v29 }
 0x40b   : > { %v1085_v31 = vpop.xlane.xlu2 %1084 }
 0x40c   : > { %v1087_v32 = vsub.f32 %v1077_v17, %v1085_v31  ;;  %v1011_v53 = vpop.f32.mrf.mxu0 }
 0x40e   : > { %v1090_v33 = vmul.f32 1.442695, %v1087_v32 }
 0x410   : > { %1941 = vpow2.f32 %v1090_v33 }
 0x416   : > { %v1942_v34 = vpop.eup %1941 }
 0x417   : > { %v1095_v35 = vsel %vm763_vm2, %v1942_v34, 0.0 }
 0x418   : > { %1096 = vadd.xlane.f32.xlu0 %v1095_v35 }
 0x42c   : > { %1260 = vrot.lane.b32.xlu0 %v2207_v22, %s2032_s14 }
 0x438   : > { %v1094_v25 = vpop.xlane.xlu1 %1093 }
 0x439   : > { %1943 = vrcp.f32 %v1094_v25 }
 0x43f   : > { %v1944_v36 = vpop.eup %1943 }
 0x440   : > { %v1100_v37 = vmul.f32 %v1944_v36, %v1940_v24 }
 0x442   : > { %v1102_v38 = vpack.c.bf16 %v1100_v37, %v1100_v37  ;;  %v1032_v37 = vadd.f32 %v1031_v2, %v1011_v53  ;;  %v1868_v2 = vld [vmem:[%s2175_s30 + $0x38] sm:$0xff] }
 0x444   : > { %1799 = vmatmul.msk.bf16.vlgmr.msrb.gmra.mxu0 %vm763_vm2, %v1102_v38 }
 0x44f   : > { %v1188_v39 = vpop.f32.mrf.mxu3 }
 0x450   : > { %v1189_v40 = vadd.f32 %v1188_v39, %v2231_v43  ;;  %v1193_v41 = vpop.permute.xlu1 %1192 }
 0x452   : > { %v1215_v42 = vsel %vm763_vm2, %v1189_v40, -inf }
 0x453   : > { %1216 = vmax.xlane.f32.xlu2 %v1215_v42 }
 0x454   : > { %1803 = vmatmul.msk.bf16.vlgmr.msra.gmra.mxu0 %vm763_vm2, %v1193_v41 }
 0x457   : > { %v1190_v44 = vpop.f32.mrf.mxu3 }
 0x458   : > { %v1126_v45 = vpop.permute.xlu1 %1125 }
 0x459   : > { %v1131_v22 = vsel %vm836_vm3, %v1126_v45, 0 }
 0x45a   : > { %1140 = vmatpush.bf16.msra.mxu1 %v1131_v22 }
 0x48b   : > { %v1097_v48 = vpop.xlane.xlu0 %1096 }
 0x48c   : > { %1945 = vrcp.f32 %v1097_v48 }
 0x492   : > { %v1946_v49 = vpop.eup %1945 }
 0x493   : > { %v1101_v50 = vmul.f32 %v1946_v49, %v1942_v34  ;;  %v1916_v34 = vld [vmem:[%s2440_s23] ss:$0 sm:$0xff] }
 0x495   : > { %v1103_v43 = vpack.c.bf16 %v1101_v50, %v1101_v50 }
 0x497   : > { %1800 = vmatmul.msk.bf16.vlgmr.msra.gmra.mxu1 %vm763_vm2, %v1103_v43 }
 0x49e   : > { %v1261_v51 = vpop.permute.xlu0 %1260 }
 0x49f   : > { %v1266_v52 = vsel %vm836_vm3, %v1261_v51, 0 }
 0x4a0   : > { %1275 = vmatpush.bf16.msrb.mxu2 %v1266_v52 }
 0x4c1   : > { %v1121_v55 = vpop.f32.mrf.mxu0 }
 0x4c6   : > { %v1217_v56 = vpop.xlane.xlu2 %1216 }
 0x4c7   : > { %v1221_v57 = vsub.f32 %v1189_v40, %v1217_v56 }
 0x4c9   : > { %v1223_v58 = vmul.f32 1.442695, %v1221_v57  ;;  %v1123_v59 = vpop.f32.mrf.mxu0 }
 0x4cb   : > { %1947 = vpow2.f32 %v1223_v58 }
 0x4d1   : > { %v1948_v60 = vpop.eup %1947  ;;  %v1211_v61 = vpop.f32.mrf.mxu0 }
 0x4d2   : > { %v1212_v62 = vadd.f32 %v1211_v61, %v2240_v54  ;;  %v1227_v63 = vsel %vm763_vm2, %v1948_v60, 0.0  ;;  %v1860_v61 = vld [vmem:[%s2165_s24 + $0x8] sm:$0xff] }
 0x4d3   : > { %1228 = vadd.xlane.f32.xlu2 %v1227_v63  ;;  %1405 = vmatpush.bf16.msrb.mxu0 %v1860_v61 }
 0x4d4   : > { %v1218_v0 = vsel %vm763_vm2, %v1212_v62, -inf }
 0x4d5   : > { %1219 = vmax.xlane.f32.xlu1 %v1218_v0 }
 0x4d9   : > { %v1213_v1 = vpop.f32.mrf.mxu0 }
 0x4da   : > { %v1859_v1 = vld [vmem:[%s2165_s24] sm:$0xff] }
 0x4db   : > { %1406 = vmatpush.bf16.msrb.mxu0 %v1859_v1 }
 0x514   : > { %v1142_v3 = vpop.f32.mrf.mxu1 }
 0x515   : > { %v1146_v6 = vpack.c.bf16 %v1142_v3, %v1121_v55 }
 0x517   : > { %1801 = vmatmul.msk.bf16.vlgmr.msra.gmra.mxu2 %vm763_vm2, %v1146_v6 }
 0x51c   : > { %v1144_v7 = vpop.f32.mrf.mxu1 }
 0x51d   : > { %v1867_v7 = vld [vmem:[%s2175_s30 + $0x30] sm:$0xff] }
 0x546   : > { %v1229_v15 = vpop.xlane.xlu2 %1228 }
 0x548   : > { %v1220_v8 = vpop.xlane.xlu1 %1219 }
 0x549   : > { %v1222_v9 = vsub.f32 %v1212_v62, %v1220_v8 }
 0x54b   : > { %v1225_v10 = vmul.f32 1.442695, %v1222_v9 }
 0x54d   : > { %1949 = vpow2.f32 %v1225_v10 }
 0x54e   : > { %1951 = vrcp.f32 %v1229_v15 }
 0x553   : > { %v1950_v11 = vpop.eup %1949 }
 0x554   : > { %v1230_v54 = vsel %vm763_vm2, %v1950_v11, 0.0  ;;  %v1952_v17 = vpop.eup %1951 }
 0x555   : > { %1231 = vadd.xlane.f32.xlu2 %v1230_v54  ;;  %v1235_v23 = vmul.f32 %v1952_v17, %v1948_v60 }
 0x557   : > { %v1237_v26 = vpack.c.bf16 %v1235_v23, %v1235_v23 }
 0x56d   : > { %1239 = vrot.lane.b32.xlu2 %v2203_v13, %s2032_s14  ;;  %v747_v13 = vld [vmem:[%s2148_s28 + $0xc] sm:$0xf] }
 0x56e   : > { %v1286_v27 = vsel %vm836_vm3, %v747_v13, 0 }
 0x56f   : > { %1295 = vmatpush.bf16.msrb.mxu3 %v1286_v27 }
 0x59a   : > { %v1162_v12 = vpop.f32.mrf.mxu2 }
 0x59b   : > { %v1167_v14 = vadd.f32 %v1162_v12, %v2294_v30 }
 0x5a2   : > { %v1164_v28 = vpop.f32.mrf.mxu2 }
 0x5a3   : > { %v1168_v39 = vadd.f32 %v1164_v28, %v1032_v37  ;;  %v1918_v28 = vld [vmem:[%s2442_s17] ss:$0 sm:$0xff] }
 0x5a4   : > { %v1861_v37 = vld [vmem:[%s2175_s30] sm:$0xff] }
 0x5c8   : > { %v1232_v16 = vpop.xlane.xlu2 %1231 }
 0x5c9   : > { %1953 = vrcp.f32 %v1232_v16 }
 0x5ca   : > { %1955 = vrcp.f32 %v2033_v46  ;;  %v1920_v46 = vld [vmem:[%s677_s0] ss:$0 sm:$0xff] }
 0x5cf   : > { %v1954_v18 = vpop.eup %1953 }
 0x5d0   : > { %v1236_v19 = vmul.f32 %v1954_v18, %v1950_v11  ;;  %v1240_v20 = vpop.permute.xlu2 %1239  ;;  %v1956_v47 = vpop.eup %1955  ;;  %v1866_v11 = vld [vmem:[%s2175_s30 + $0x28] sm:$0xff] }
 0x5d1   : > { %v1245_v21 = vsel %vm836_vm3, %v1240_v20, 0  ;;  %v1321_v48 = vmul.f32 32.0, %v1956_v47  ;;  %vm1325_vm6 = vweird.f32 %v1956_v47 }
 0x5d2   : > { %v1238_v24 = vpack.c.bf16 %v1236_v19, %v1236_v19  ;;  %1254 = vmatpush.bf16.msrb.mxu1 %v1245_v21 }
 0x5d3   : > { %v1322_v49 = vsub.f32 1.0, %v1321_v48 }
 0x5d4   : > { %1805 = vmatmul.msk.bf16.vlgmr.msrb.gmra.mxu2 %vm763_vm2, %v1238_v24  ;;  %v1917_v24 = vld [vmem:[%s2441_s26] ss:$0 sm:$0xff] }
 0x5d5   : > { %1804 = vmatmul.msk.bf16.vlgmr.msrb.gmra.mxu1 %vm763_vm2, %v1237_v26  ;;  %v1323_v50 = vmul.f32 %v1956_v47, %v1322_v49 }
 0x5d6   : > { %1484 = vmatpush.bf16.msra.mxu1 %v1868_v2 }
 0x5da   : > { %1485 = vmatpush.bf16.msra.mxu1 %v1867_v7 }
 0x5de   : > { %1486 = vmatpush.bf16.msra.mxu1 %v1866_v11 }
 0x652   : > { %v1256_v29 = vpop.f32.mrf.mxu1 }
 0x657   : > { %v1277_v30 = vpop.f32.mrf.mxu2 }
 0x658   : > { %v1281_v31 = vpack.c.bf16 %v1277_v30, %v1256_v29 }
 0x65a   : > { %v1258_v32 = vpop.f32.mrf.mxu1  ;;  %1806 = vmatmul.msk.bf16.vlgmr.msrb.gmra.mxu3 %vm763_vm2, %v1281_v31 }
 0x65f   : > { %v1279_v33 = vpop.f32.mrf.mxu2 }
 0x6dd   : > { %v1297_v35 = vpop.f32.mrf.mxu3 }
 0x6de   : > { %v1302_v25 = vadd.f32 %v1297_v35, %v1167_v14  ;;  %v1865_v14 = vld [vmem:[%s2175_s30 + $0x20] sm:$0xff]  ;;  %v1864_v35 = vld [vmem:[%s2175_s30 + $0x18] sm:$0xff] }
 0x6df   : > { %1487 = vmatpush.bf16.msra.mxu1 %v1865_v14 }
 0x6e0   : > { %v1308_v36 = vadd.f32 %v1916_v34, %v1302_v25  ;;  %v1863_v25 = vld [vmem:[%s2175_s30 + $0x10] sm:$0xff] }
 0x6e2   : > { %v1310_v38 = vadd.f32 %v1308_v36, %v2196_v4  ;;  %v1324_v4 = vadd.f32 %v1956_v47, %v1323_v50  ;;  %v1862_v36 = vld [vmem:[%s2175_s30 + $0x8] sm:$0xff] }
 0x6e3   : > { %1488 = vmatpush.bf16.msra.mxu1 %v1864_v35 }
 0x6e4   : > { %v1314_v40 = vsel %vm718_vm1, %v1310_v38, 0.0  ;;  %v2331_v43 = vsel %vm1325_vm6, %v1956_v47, %v1324_v4 }
 0x6e5   : > { %1315 = vadd.xlane.f32.xlu1 %v1314_v40  ;;  %v1299_v41 = vpop.f32.mrf.mxu3 }
 0x6e6   : > { %v1303_v42 = vadd.f32 %v1299_v41, %v1168_v39  ;;  %v1919_v39 = vld [vmem:[%s669_s2] ss:$0 sm:$0xff] }
 0x6e7   : > { %1489 = vmatpush.bf16.msra.mxu1 %v1863_v25 }
 0x6e8   : > { %v1309_v44 = vadd.f32 %v1916_v34, %v1303_v42 }
 0x6ea   : > { %v1311_v45 = vadd.f32 %v1309_v44, %v2198_v5 }
 0x6eb   : > { %1490 = vmatpush.bf16.msra.mxu1 %v1862_v36 }
 0x6ec   : > { %v1317_v22 = vsel %vm718_vm1, %v1311_v45, 0.0 }
 0x6ed   : > { %1318 = vadd.xlane.f32.xlu0 %v1317_v22 }
 0x6ef   : > { %1491 = vmatpush.bf16.msra.mxu1 %v1861_v37 }
 0x758   : > { %v1316_v51 = vpop.xlane.xlu1 %1315 }
 0x759   : > { %v1327_v52 = vmul.f32 %v2331_v43, %v1316_v51 }
 0x75b   : > { %v1329_v53 = vsub.f32 %v1310_v38, %v1327_v52 }
 0x75d   : > { %v1331_v5 = vmul.f32 %v1329_v53, %v1329_v53 }
 0x75f   : > { %v1333_v55 = vsel %vm718_vm1, %v1331_v5, 0.0 }
 0x760   : > { %1334 = vadd.xlane.f32.xlu1 %v1333_v55  ;;  %v1319_v56 = vpop.xlane.xlu0 %1318 }
 0x761   : > { %v1328_v57 = vmul.f32 %v2331_v43, %v1319_v56 }
 0x763   : > { %v1330_v58 = vsub.f32 %v1311_v45, %v1328_v57 }
 0x765   : > { %v1332_v59 = vmul.f32 %v1330_v58, %v1330_v58 }
 0x767   : > { %v1336_v60 = vsel %vm718_vm1, %v1332_v59, 0.0 }
 0x768   : > { %1337 = vadd.xlane.f32.xlu1 %v1336_v60 }
 0x7d3   : > { %v1335_v62 = vpop.xlane.xlu1 %1334 }
 0x7d4   : > { %v1339_v63 = vmul.f32 %v1335_v62, %v2331_v43 }
 0x7d6   : > { %v1341_v0 = vadd.f32 1e-05, %v1339_v63 }
 0x7d8   : > { %1957 = vrsqrt.f32 %v1341_v0  ;;  %vm1349_vm8 = vweird.f32 %v1341_v0 }
 0x7db   : > { %v1338_v3 = vpop.xlane.xlu1 %1337 }
 0x7dc   : > { %v1340_v6 = vmul.f32 %v1338_v3, %v2331_v43 }
 0x7de   : > { %v1958_v8 = vpop.eup %1957  ;;  %v1342_v9 = vadd.f32 1e-05, %v1340_v6 }
 0x7df   : > { %v1344_v10 = vmul.f32 %v1958_v8, %v1341_v0  ;;  %vm1350_vm7 = vweird.f32 %v1958_v8 }
 0x7e0   : > { %1959 = vrsqrt.f32 %v1342_v9  ;;  %vm1351_vm9 = vmor %vm1349_vm8, %vm1350_vm7  ;;  %vm1359_vm11 = vweird.f32 %v1342_v9 }
 0x7e1   : > { %v1345_v54 = vmul.f32 %v1958_v8, %v1344_v10 }
 0x7e3   : > { %v1346_v12 = vmul.f32 0.5, %v1345_v54 }
 0x7e5   : > { %v1347_v15 = vsub.f32 1.5, %v1346_v12 }
 0x7e6   : > { %v1960_v16 = vpop.eup %1959 }
 0x7e7   : > { %v1348_v17 = vmul.f32 %v1958_v8, %v1347_v15  ;;  %v1354_v18 = vmul.f32 %v1960_v16, %v1342_v9  ;;  %vm1360_vm10 = vweird.f32 %v1960_v16 }
 0x7e8   : > { %vm1361_vm12 = vmor %vm1359_vm11, %vm1360_vm10 }
 0x7e9   : > { %v1355_v23 = vmul.f32 %v1960_v16, %v1354_v18  ;;  %v1352_v19 = vsel %vm1351_vm9, %v1958_v8, %v1348_v17  ;;  %v1922_v18 = vld [vmem:[%s683_s1] ss:$0 sm:$0xff] }
 0x7ea   : > { %v1363_v26 = vmul.f32 %v1352_v19, %v1329_v53 }
 0x7eb   : > { %v1356_v20 = vmul.f32 0.5, %v1355_v23 }
 0x7ec   : > { %v1368_v29 = vmul.f32 %v1917_v24, %v1363_v26 }
 0x7ed   : > { %v1357_v21 = vsub.f32 1.5, %v1356_v20 }
 0x7ee   : > { %v1373_v32 = vadd.f32 %v1918_v28, %v1368_v29 }
 0x7ef   : > { %v1358_v13 = vmul.f32 %v1960_v16, %v1357_v21 }
 0x7f1   : > { %v1362_v27 = vsel %vm1361_vm12, %v1960_v16, %v1358_v13  ;;  %v1921_v16 = vld [vmem:[%s680_s3] ss:$0 sm:$0xff] }
 0x7f2   : > { %v1364_v30 = vmul.f32 %v1362_v27, %v1330_v58 }
 0x7f4   : > { %v1369_v31 = vmul.f32 %v1917_v24, %v1364_v30 }
 0x7f6   : > { %v1374_v33 = vadd.f32 %v1918_v28, %v1369_v31 }
 0x7f8   : > { %v1375_v34 = vpack.c.bf16 %v1374_v33, %v1373_v32 }
 0x7fa   : > { %1815 = vmatmul.msk.bf16.vlgmr.msrb.gmra.mxu0 %vm718_vm1, %v1375_v34 }
 0x877   : > { %v1408_v38 = vpop.f32.mrf.mxu0 }
 0x878   : > { %v1409_v40 = vadd.f32 %v1919_v39, %v1408_v38 }
 0x87a   : > { %v1413_v44 = vmax.f32 %v1409_v40, 0.0 }
 0x87f   : > { %v1410_v41 = vpop.f32.mrf.mxu0 }
 0x880   : > { %v1411_v42 = vadd.f32 %v1919_v39, %v1410_v41 }
 0x882   : > { %v1414_v45 = vmax.f32 %v1411_v42, 0.0 }
 0x884   : > { %v1415_v22 = vpack.c.bf16 %v1414_v45, %v1413_v44 }
 0x886   : > { %1492 = vmatmul.bf16.vlgmr.msra.gmra.mxu1 %v1415_v22 }
 0x903   : > { %v1493_v47 = vpop.f32.mrf.mxu1 }
 0x904   : > { %v1494_v48 = vadd.f32 %v1920_v46, %v1493_v47 }
 0x906   : > { %v1498_v49 = vadd.f32 %v1494_v48, %v1373_v32 }
 0x908   : > { %v1502_v50 = vsel %vm718_vm1, %v1498_v49, 0.0 }
 0x909   : > { %1503 = vadd.xlane.f32.xlu2 %v1502_v50 }
 0x90b   : > { %v1495_v4 = vpop.f32.mrf.mxu1 }
 0x90c   : > { %v1496_v51 = vadd.f32 %v1920_v46, %v1495_v4 }
 0x90e   : > { %v1499_v52 = vadd.f32 %v1496_v51, %v1374_v33 }
 0x910   : > { %v1505_v53 = vsel %vm718_vm1, %v1499_v52, 0.0 }
 0x911   : > { %1506 = vadd.xlane.f32.xlu1 %v1505_v53 }
 0x97c   : > { %v1504_v5 = vpop.xlane.xlu2 %1503 }
 0x97d   : > { %v1508_v55 = vmul.f32 %v1504_v5, %v2331_v43 }
 0x97f   : > { %v1510_v56 = vsub.f32 %v1498_v49, %v1508_v55 }
 0x981   : > { %v1512_v57 = vmul.f32 %v1510_v56, %v1510_v56 }
 0x983   : > { %v1514_v58 = vsel %vm718_vm1, %v1512_v57, 0.0 }
 0x984   : > { %v1507_v59 = vpop.xlane.xlu1 %1506  ;;  %1515 = vadd.xlane.f32.xlu1 %v1514_v58 }
 0x985   : > { %v1509_v60 = vmul.f32 %v1507_v59, %v2331_v43 }
 0x987   : > { %v1511_v61 = vsub.f32 %v1499_v52, %v1509_v60 }
 0x989   : > { %v1513_v62 = vmul.f32 %v1511_v61, %v1511_v61 }
 0x98b   : > { %v1517_v63 = vsel %vm718_vm1, %v1513_v62, 0.0 }
 0x98c   : > { %1518 = vadd.xlane.f32.xlu1 %v1517_v63 }
 0x9f7   : > { %v1516_v0 = vpop.xlane.xlu1 %1515 }
 0x9f8   : > { %v1520_v1 = vmul.f32 %v1516_v0, %v2331_v43 }
 0x9fa   : > { %v1522_v2 = vadd.f32 1e-05, %v1520_v1 }
 0x9fc   : > { %1961 = vrsqrt.f32 %v1522_v2  ;;  %vm1530_vm14 = vweird.f32 %v1522_v2 }
 0x9ff   : > { %v1519_v3 = vpop.xlane.xlu1 %1518 }
 0xa00   : > { %v1521_v6 = vmul.f32 %v1519_v3, %v2331_v43 }
 0xa02   : > { %v1962_v7 = vpop.eup %1961  ;;  %v1523_v8 = vadd.f32 1e-05, %v1521_v6 }
 0xa03   : > { %v1525_v9 = vmul.f32 %v1962_v7, %v1522_v2  ;;  %vm1531_vm13 = vweird.f32 %v1962_v7 }
 0xa04   : > { %1963 = vrsqrt.f32 %v1523_v8  ;;  %vm1532_vm15 = vmor %vm1530_vm14, %vm1531_vm13  ;;  %vm1540_vm2 = vweird.f32 %v1523_v8 }
 0xa05   : > { %v1526_v10 = vmul.f32 %v1962_v7, %v1525_v9 }
 0xa07   : > { %v1527_v11 = vmul.f32 0.5, %v1526_v10 }
 0xa09   : > { %v1528_v54 = vsub.f32 1.5, %v1527_v11 }
 0xa0a   : > { %v1964_v12 = vpop.eup %1963 }
 0xa0b   : > { %v1529_v14 = vmul.f32 %v1962_v7, %v1528_v54  ;;  %v1535_v15 = vmul.f32 %v1964_v12, %v1523_v8  ;;  %vm1541_vm0 = vweird.f32 %v1964_v12 }
 0xa0c   : > { %vm1542_vm3 = vmor %vm1540_vm2, %vm1541_vm0 }
 0xa0d   : > { %v1533_v43 = vsel %vm1532_vm15, %v1962_v7, %v1529_v14  ;;  %v1536_v17 = vmul.f32 %v1964_v12, %v1535_v15 }
 0xa0e   : > { %v1544_v23 = vmul.f32 %v1533_v43, %v1510_v56 }
 0xa0f   : > { %v1537_v19 = vmul.f32 0.5, %v1536_v17 }
 0xa10   : > { %v1549_v20 = vmul.f32 %v1921_v16, %v1544_v23 }
 0xa11   : > { %v1538_v21 = vsub.f32 1.5, %v1537_v19 }
 0xa12   : > { %v1554_v24 = vadd.f32 %v1922_v18, %v1549_v20 }
 0xa13   : > { %v1539_v26 = vmul.f32 %v1964_v12, %v1538_v21 }
 0xa14   : > { %1556 = vst.msk [vmem:[#allocation2] sm:$0xff] %vm718_vm1, %v1554_v24 }
 0xa15   : > { %v1543_v13 = vsel %vm1542_vm3, %v1964_v12, %v1539_v26 }
 0xa16   : > { %v1545_v27 = vmul.f32 %v1543_v13, %v1511_v61 }
 0xa18   : > { %v1550_v28 = vmul.f32 %v1921_v16, %v1545_v27  ;;  %1561 = sbr.rel (%p1848_p6) target bundleno = 2591 (0xa1f), region = 84 }
 0xa1a   : > { %v1555_v29 = vadd.f32 %v1922_v18, %v1550_v28 }
 0xa1c   : > { %1557 = vst.msk [vmem:[#allocation2 + $0x8] sm:$0xff] %vm718_vm1, %v1555_v29 }
 0xa1d   : > { %1562 = vst.msk [vmem:[#allocation3] sm:$0xff] %vm718_vm1, %v1554_v24 }
 0xa1e   : > { %1563 = vst.msk [vmem:[#allocation3 + $0x8] sm:$0xff] %vm718_vm1, %v1555_v29 }
 0xa1f PF: > { %s2443_s1 = sld [smem:[#allocation7_spill]]  ;;  %s2034_s24 = smov [#allocation3]  }
 0xa20   : > { %s2445_s23 = sld [smem:[#allocation14_spill]]  ;;  %s1572_s26 = sshll.u32 %s2034_s24, 4  ;;  %s1573_s26 = int_to_ptr.vmem [resolvable:$true] %s1572_s26 }
 0xa21   : > { %s2035_s27 = smov 128   ;;  %s2036_s4 = smov 8  }
 0xa25   : > { %s2444_s18 = sadd.s32 4294967295, %s2443_s1  }
 0xa26   : > { %p1873_p7 = scmp.eq.s32.totalorder %s2444_s18, 1  ;;  %s1574_s28 = sshll.u32 %s2445_s23, 4  ;;  %s1575_s28 = int_to_ptr.hbm [resolvable:$true] %s1574_s28 }
 0xa28   : > { %1870 = dma.vmem_to_hbm [thread:$0]  (%p1873_p7), %s1573_s26, 256, %s1575_s28, [#allocation4], %s2035_s27, %s2035_s27, %s2036_s4  }
 0xa29   : > { %2006 = dma.done.wait (%p1873_p7), [#allocation4], 256  }
 0xa2a   : > { %2008 = vsyncadd (%p1873_p7), [#allocation4], 4294967040 }
 0xa2b PF: > { %s2446_s29 = sld [smem:[#allocation7_spill]] }
 0xa2c   : > { %s2448_s30 = sld [smem:[#allocation8_spill]] }
 0xa31   : > { %s25_s15 = sadd.s32 1, %s2446_s29   ;;  %s2447_s29 = sld [smem:[#allocation6_spill]] }
 0xa32   : > { %p22_p8 = scmp.ge.s32.totalorder %s25_s15, 4  }
 0xa34   :  { %24 = sbr.rel (!%p22_p8) target bundleno = 9 (0x9), region = 151 }
 0xa39   :  { %1591 = vsyncpa [#allocation4], 1 }
 0xa3a   :  { %1593 = vsyncpa [#allocation4 + $0x1], 1 }

</bundles_post_ra>
